<compile_context>
chip_gen: v7x
topology: tpu7x:2x2x1
jax: 0.10.0
libtpu: 0.0.40
codegen_flags: <defaults>
</compile_context>

<pallas_src>
import functools
import math

import jax
import jax.numpy as jnp
from jax.experimental import pallas as pl
from jax.experimental.pallas import tpu as pltpu

_NEG_BIG = -1e30  # finite "-inf" sentinel: avoids inf-inf -> nan in online LSE


# ---------------------------------------------------------------------------
# Tile sizing / VMEM budget
# ---------------------------------------------------------------------------
def _vmem_budget_bytes():
    """~80% of physical VMEM, capped at 100 MiB (v5e/v6e); ~51 MiB on v7x."""
    try:
        cap = int(pltpu.get_tpu_info().vmem_capacity_bytes)
    except Exception:
        cap = 64 << 20            # conservative default (v7x physical)
    return min((cap * 4) // 5, 100 << 20)


def _auto_tile(n, dx, dz, hidden, operand_itemsize, budget_bytes):
    dxz = dx + dz
    weight_bytes = (dxz * hidden + hidden * hidden + hidden) * operand_itemsize \
        + 3 * hidden * 4
    # per-row live bytes: double-buffered stacked input tiles (joint+marginal)
    # + f32 h1/h2 intermediates for both halves (2x slack).
    per_row = 2 * (2 * dxz * operand_itemsize) + 2 * (2 * hidden * 4) * 2
    avail = max(budget_bytes - weight_bytes - (4 << 20), per_row)
    t = int(min(avail // per_row, 2048))
    if t >= n:
        return n
    return max(128, (t // 128) * 128)


# ---------------------------------------------------------------------------
# Kernel
# ---------------------------------------------------------------------------
def _make_kernel(n_rows, tile, tiles_per_part, compute_dtype, fused):
    cd = compute_dtype

    def _init(tsum_ref, m_ref, s_ref):
        @pl.when(pl.program_id(1) == 0)
        def _():
            tsum_ref[...] = jnp.zeros_like(tsum_ref)
            m_ref[...] = jnp.full_like(m_ref, _NEG_BIG)
            s_ref[...] = jnp.zeros_like(s_ref)

    def _tail(t_joint, t_marg, out_ref, tsum_ref, m_ref, s_ref):
        i = pl.program_id(1)
        # Global row index of this (possibly phantom / partial) tile.
        g = pl.program_id(0) * tiles_per_part + i
        row = jax.lax.broadcasted_iota(jnp.int32, (tile, 1), 0) + g * tile
        valid = row < n_rows                                    # (tile, 1)

        # Online (streaming) logsumexp over t_marg + running sum of t_joint.
        m_prev = m_ref[...]                                     # (1, 1)
        m_loc = jnp.max(jnp.where(valid, t_marg, _NEG_BIG), axis=0, keepdims=True)
        m_new = jnp.maximum(m_prev, m_loc)
        p_sum = jnp.sum(jnp.where(valid, jnp.exp(t_marg - m_new), 0.0),
                        axis=0, keepdims=True)
        s_ref[...] = s_ref[...] * jnp.exp(m_prev - m_new) + p_sum
        m_ref[...] = m_new
        tsum_ref[...] = tsum_ref[...] + jnp.sum(jnp.where(valid, t_joint, 0.0),
                                                axis=0, keepdims=True)

        @pl.when(i == pl.num_programs(1) - 1)
        def _finalize():
            # Per-partition partials; the tiny combine happens in the wrapper.
            out_ref[0, 0] = jnp.sum(tsum_ref[...])
            out_ref[0, 1] = jnp.sum(m_ref[...])
            out_ref[0, 2] = jnp.sum(s_ref[...])

    if fused:
        # Layer 1 fused: single (tile, Dx+Dz) @ (Dx+Dz, H) matmul per half.
        def kernel(xz_ref, w1_ref, b1_ref, w2_ref, b2_ref, w3_ref, b3_ref,
                   out_ref, tsum_ref, m_ref, s_ref):
            _init(tsum_ref, m_ref, s_ref)

            def critic(xzb):                                    # (tile, Dxz) in cd
                h1 = jnp.maximum(
                    jnp.dot(xzb, w1_ref[...],
                            preferred_element_type=jnp.float32) + b1_ref[...], 0.0)
                h2 = jnp.maximum(
                    jnp.dot(h1.astype(cd), w2_ref[...],
                            preferred_element_type=jnp.float32) + b2_ref[...], 0.0)
                return jnp.dot(h2.astype(cd), w3_ref[...],
                               preferred_element_type=jnp.float32) + b3_ref[...]

            t_joint = critic(xz_ref[0])                         # joint half
            t_marg = critic(xz_ref[1])                          # marginal half
            _tail(t_joint, t_marg, out_ref, tsum_ref, m_ref, s_ref)

        return kernel

    # Split layer 1 (Dx + Dz > 128): hx computed once, broadcast-added to hz.
    def kernel(x_ref, zst_ref, w1x_ref, w1z_ref, b1_ref, w2_ref, b2_ref,
               w3_ref, b3_ref, out_ref, tsum_ref, m_ref, s_ref):
        _init(tsum_ref, m_ref, s_ref)

        hx = jnp.dot(x_ref[...], w1x_ref[...],
                     preferred_element_type=jnp.float32) + b1_ref[...]  # (tile, H) f32

        def critic(zb):                                         # (tile, Dz) in cd
            h1 = jnp.maximum(
                hx + jnp.dot(zb, w1z_ref[...],
                             preferred_element_type=jnp.float32), 0.0)
            h2 = jnp.maximum(
                jnp.dot(h1.astype(cd), w2_ref[...],
                        preferred_element_type=jnp.float32) + b2_ref[...], 0.0)
            return jnp.dot(h2.astype(cd), w3_ref[...],
                           preferred_element_type=jnp.float32) + b3_ref[...]

        t_joint = critic(zst_ref[0])
        t_marg = critic(zst_ref[1])
        _tail(t_joint, t_marg, out_ref, tsum_ref, m_ref, s_ref)

    return kernel


# ---------------------------------------------------------------------------
# Wrapper
# ---------------------------------------------------------------------------
def init_params(key, dim_x, dim_z, hidden, dtype=jnp.float32):
    """PyTorch-style uniform(-1/sqrt(fan_in), 1/sqrt(fan_in)) init, deterministic."""
    def linear(k, fan_in, fan_out):
        kw, kb = jax.random.split(k)
        bound = 1.0 / math.sqrt(fan_in)
        w = jax.random.uniform(kw, (fan_in, fan_out), dtype, -bound, bound)
        b = jax.random.uniform(kb, (1, fan_out), dtype, -bound, bound)
        return w, b

    k1, k2, k3, k4 = jax.random.split(key, 4)
    w1x, b1x = linear(k1, dim_x, hidden)
    w1z, b1z = linear(k2, dim_z, hidden)
    w2, b2 = linear(k3, hidden, hidden)
    w3, b3 = linear(k4, hidden, 1)
    return dict(w1x=w1x, b1x=b1x, w1z=w1z, b1z=b1z, w2=w2, b2=b2, w3=w3, b3=b3)


@functools.partial(jax.jit, static_argnames=("tile", "compute_dtype",
                                             "num_partitions", "vmem_limit_bytes"))
def mine_pallas_call(params, x, z, z_marg, *, tile=None,
                     compute_dtype=jnp.bfloat16, num_partitions=2,
                     vmem_limit_bytes=None):
    """Returns a (3,) f32 array: [loss, t_exp (=mean exp(t_marg)), max(t_marg)]."""
    n, dx = x.shape
    dz = z.shape[1]
    hidden = params['w1x'].shape[1]
    cd = jnp.dtype(compute_dtype)
    fused = (dx + dz) <= 128

    budget = int(vmem_limit_bytes) if vmem_limit_bytes is not None \
        else _vmem_budget_bytes()
    if tile is None:
        tile = _auto_tile(n, dx, dz, hidden, cd.itemsize, budget)
    tile = int(tile)
    if tile >= n:
        tile = n                              # block == full dim (always legal)
    else:
        tile = max(8, (tile // 8) * 8)        # keep sublane-aligned

    num_tiles = pl.cdiv(n, tile)
    nparts = max(1, min(int(num_partitions), num_tiles))
    tpp = pl.cdiv(num_tiles, nparts)
    grid = (nparts, tpp)

    def blk_idx(p, i):                        # clamp phantom tiles to a legal block
        return jnp.minimum(p * tpp + i, num_tiles - 1)

    const2 = lambda p, i: (0, 0)

    # Weights pre-cast ONCE in the wrapper (resident via constant index_map).
    b1 = (params['b1x'] + params['b1z']).astype(jnp.float32)     # fused layer-1 bias
    w2 = params['w2'].astype(cd)
    b2 = params['b2'].astype(jnp.float32)
    w3 = params['w3'].astype(cd)                                 # (H, 1)
    b3 = params['b3'].astype(jnp.float32)                        # (1, 1)

    kernel = _make_kernel(n, tile, tpp, cd, fused)

    if fused:
        dxz = dx + dz
        # Stacked [x|z ; x|z_marg] built once outside the kernel: one DMA/step,
        # single fused layer-1 matmul per half, inputs already in compute dtype.
        xz = jnp.stack([jnp.concatenate([x, z], axis=-1),
                        jnp.concatenate([x, z_marg], axis=-1)], axis=0).astype(cd)
        w1 = jnp.concatenate([params['w1x'], params['w1z']], axis=0).astype(cd)
        in_specs = [
            pl.BlockSpec((2, tile, dxz), lambda p, i: (0, blk_idx(p, i), 0)),
            pl.BlockSpec((dxz, hidden), const2),       # W1  (resident)
            pl.BlockSpec((1, hidden), const2),         # b1
            pl.BlockSpec((hidden, hidden), const2),    # W2
            pl.BlockSpec((1, hidden), const2),         # b2
            pl.BlockSpec((hidden, 1), const2),         # W3
            pl.BlockSpec((1, 1), const2),              # b3
        ]
        args = (xz, w1, b1, w2, b2, w3, b3)
    else:
        xq = x.astype(cd)
        zst = jnp.stack([z, z_marg], axis=0).astype(cd)          # (2, N, Dz)
        in_specs = [
            pl.BlockSpec((tile, dx), lambda p, i: (blk_idx(p, i), 0)),
            pl.BlockSpec((2, tile, dz), lambda p, i: (0, blk_idx(p, i), 0)),
            pl.BlockSpec((dx, hidden), const2),        # W1x (resident)
            pl.BlockSpec((dz, hidden), const2),        # W1z
            pl.BlockSpec((1, hidden), const2),         # b1
            pl.BlockSpec((hidden, hidden), const2),    # W2
            pl.BlockSpec((1, hidden), const2),         # b2
            pl.BlockSpec((hidden, 1), const2),         # W3
            pl.BlockSpec((1, 1), const2),              # b3
        ]
        args = (xq, zst, params['w1x'].astype(cd), params['w1z'].astype(cd),
                b1, w2, b2, w3, b3)

    out_specs = pl.BlockSpec((1, 3), lambda p, i: (p, 0),
                             memory_space=pltpu.MemorySpace.SMEM)

    parts = pl.pallas_call(
        kernel,
        out_shape=jax.ShapeDtypeStruct((nparts, 3), jnp.float32),
        grid=grid,
        in_specs=in_specs,
        out_specs=out_specs,
        scratch_shapes=[pltpu.VMEM((1, 1), jnp.float32),   # sum(t_joint)
                        pltpu.VMEM((1, 1), jnp.float32),   # running max(t_marg)
                        pltpu.VMEM((1, 1), jnp.float32)],  # running sum exp(t_marg - max)
        compiler_params=pltpu.CompilerParams(
            dimension_semantics=("parallel", "arbitrary"),
            vmem_limit_bytes=int(budget)),
    )(*args)

    # Combine per-partition partials (tiny, plain JAX).
    tsum = jnp.sum(parts[:, 0])
    m = jnp.max(parts[:, 1])
    s = jnp.sum(parts[:, 2] * jnp.exp(parts[:, 1] - m))
    second = m + jnp.log(s) - math.log(n)
    loss = -(tsum / n) + second
    return jnp.stack([loss, jnp.exp(second), m])


class MinePallas:
    """Mirrors Mine.forward semantics; hot path runs in the Pallas kernel.

    EMA / bias-toggle bookkeeping stays on device (no per-step host syncs).
    """

    def __init__(self, params, loss='mine', alpha=0.01, tile=None,
                 compute_dtype=jnp.bfloat16, num_partitions=2):
        self.params = params
        self.loss = loss                       # string view; refresh via loss_mode()
        self.alpha = alpha
        self.tile = tile
        self.compute_dtype = compute_dtype
        self.num_partitions = num_partitions
        self.running_mean = jnp.float32(0.0)   # device scalar
        self.biased = jnp.asarray(False)       # device bool

    def loss_mode(self):
        self.loss = 'mine_biased' if bool(self.biased) else 'mine'
        return self.loss

    def forward(self, x, z, z_marg=None, perm_key=None):
        if z_marg is None:
            if perm_key is None:
                perm_key = jax.random.PRNGKey(1)
            z_marg = z[jax.random.permutation(perm_key, x.shape[0])]

        out = mine_pallas_call(self.params, x, z, z_marg, tile=self.tile,
                               compute_dtype=self.compute_dtype,
                               num_partitions=self.num_partitions)
        loss, t_exp, t_max = out[0], out[1], out[2]

        n = x.shape[0]
        # bias_toggle (state only; forward value of second_term is identical).
        self.biased = (t_max - math.log(n)) > 87.0
        # EMA running-mean update (matters only for the custom backward pass).
        rm = self.running_mean
        new_rm = jnp.where(rm == 0.0, t_exp,
                           self.alpha * t_exp + (1.0 - self.alpha) * rm)
        self.running_mean = jnp.where(self.biased, rm, new_rm)
        # TODO(synk): 'fdiv' loss branch (exp(t_marg - 1).mean()) not implemented.
        return loss


def _reference_forward(params, x, z, z_marg):
    """Pure-JAX f32 reference for correctness checking."""
    def stat_net(xv, zv):
        h = xv @ params['w1x'] + params['b1x'] + zv @ params['w1z'] + params['b1z']
        h = jnp.maximum(h, 0.0)
        h = jnp.maximum(h @ params['w2'] + params['b2'], 0.0)
        return h @ params['w3'] + params['b3']

    t = jnp.mean(stat_net(x, z))
    t_marg = stat_net(x, z_marg)
    second = jax.scipy.special.logsumexp(t_marg, axis=0)[0] - math.log(x.shape[0])
    return -t + second


if __name__ == "__main__":
    # --- test 1: default path (fused layer-1, bf16 MXU operands, auto tile) ---
    N, DX, DZ, HIDDEN = 200, 4, 4, 128
    key = jax.random.PRNGKey(0)
    k_params, k_x, k_z, k_perm = jax.random.split(key, 4)

    params = init_params(k_params, DX, DZ, HIDDEN)
    x = jax.random.normal(k_x, (N, DX), jnp.float32)
    z = jax.random.normal(k_z, (N, DZ), jnp.float32)
    z_marg = z[jax.random.permutation(k_perm, N)]

    ref = jax.block_until_ready(_reference_forward(params, x, z, z_marg))

    mine = MinePallas(params)                              # bf16 operands, f32 accum
    loss_bf16 = jax.block_until_ready(mine.forward(x, z, z_marg=z_marg))
    assert jnp.allclose(loss_bf16, ref, rtol=5e-2, atol=5e-2), (loss_bf16, ref)

    # --- test 2: f32, small explicit tile + 2 partitions -> exercises partial-tile
    #     masking and the per-partition logsumexp/mean combine. ---
    out32 = jax.block_until_ready(
        mine_pallas_call(params, x, z, z_marg, tile=64,
                         compute_dtype=jnp.float32, num_partitions=2))
    assert jnp.allclose(out32[0], ref, rtol=2e-3, atol=2e-3), (out32[0], ref)

    # --- test 3: split layer-1 path (Dx + Dz > 128), multi-tile with a phantom
    #     (fully padded) tile from the partition split. ---
    DX2, DZ2, N2 = 192, 16, 72
    kp2, kx2, kz2, kperm2 = jax.random.split(jax.random.PRNGKey(2), 4)
    params2 = init_params(kp2, DX2, DZ2, HIDDEN)
    x2 = jax.random.normal(kx2, (N2, DX2), jnp.float32)
    z2 = jax.random.normal(kz2, (N2, DZ2), jnp.float32)
    zm2 = z2[jax.random.permutation(kperm2, N2)]
    ref2 = jax.block_until_ready(_reference_forward(params2, x2, z2, zm2))
    out2 = jax.block_until_ready(
        mine_pallas_call(params2, x2, z2, zm2, tile=32,
                         compute_dtype=jnp.float32, num_partitions=2))
    assert jnp.allclose(out2[0], ref2, rtol=2e-3, atol=2e-3), (out2[0], ref2)

    print("KERNEL_OK")
</pallas_src>

<mosaic_0001>
module attributes {stable_mosaic.version = 11 : i64} {
  func.func @kernel(%arg0: i32, %arg1: i32, %arg2: memref<2x200x8xbf16, #tpu.memory_space<vmem>>, %arg3: memref<8x128xbf16, #tpu.memory_space<vmem>>, %arg4: memref<1x128xf32, #tpu.memory_space<vmem>>, %arg5: memref<128x128xbf16, #tpu.memory_space<vmem>>, %arg6: memref<1x128xf32, #tpu.memory_space<vmem>>, %arg7: memref<128x1xbf16, #tpu.memory_space<vmem>>, %arg8: memref<1x1xf32, #tpu.memory_space<vmem>>, %arg9: memref<1x3xf32, #tpu.memory_space<smem>>, %arg10: memref<1x1xf32, #tpu.memory_space<vmem>>, %arg11: memref<1x1xf32, #tpu.memory_space<vmem>>, %arg12: memref<1x1xf32, #tpu.memory_space<vmem>>) attributes {dimension_semantics = [#tpu.dimension_semantics<parallel>, #tpu.dimension_semantics<arbitrary>], iteration_bounds = array<i64: 1, 1>, scalar_prefetch = 0 : i64, scratch_operands = 3 : i64, tpu.core_type = #tpu.core_type<tc>, window_params = [{transform_indices = @transform_0, window_bounds = array<i64: 2, 200, 8>}, {pipeline_mode = #tpu.pipeline_mode<synchronous>, transform_indices = @transform_1, window_bounds = array<i64: 8, 128>}, {pipeline_mode = #tpu.pipeline_mode<synchronous>, transform_indices = @transform_2, window_bounds = array<i64: 1, 128>}, {pipeline_mode = #tpu.pipeline_mode<synchronous>, transform_indices = @transform_3, window_bounds = array<i64: 128, 128>}, {pipeline_mode = #tpu.pipeline_mode<synchronous>, transform_indices = @transform_4, window_bounds = array<i64: 1, 128>}, {pipeline_mode = #tpu.pipeline_mode<synchronous>, transform_indices = @transform_5, window_bounds = array<i64: 128, 1>}, {pipeline_mode = #tpu.pipeline_mode<synchronous>, transform_indices = @transform_6, window_bounds = array<i64: 1, 1>}, {transform_indices = @transform_7, window_bounds = array<i64: 1, 3>}]} {
    %c0_i32 = arith.constant 0 : i32
    %0 = arith.cmpi eq, %arg1, %c0_i32 : i32
    %1 = arith.extui %0 : i1 to i32
    %c0_i32_0 = arith.constant 0 : i32
    %2 = arith.cmpi ne, %1, %c0_i32_0 : i32
    scf.if %2 {
      %cst_59 = arith.constant 0.000000e+00 : f32
      %87 = vector.broadcast %cst_59 : f32 to vector<1x1xf32>
      %c0_60 = arith.constant 0 : index
      %c0_61 = arith.constant 0 : index
      %88 = vector.load %arg10[%c0_60, %c0_61] : memref<1x1xf32, #tpu.memory_space<vmem>>, vector<1x1xf32>
      tpu.vector_store %arg10[%c0_60, %c0_61], %87 {strides = array<i32>} : memref<1x1xf32, #tpu.memory_space<vmem>>, vector<1x1xf32>,
      %cst_62 = arith.constant -1.000000e+30 : f32
      %89 = vector.broadcast %cst_62 : f32 to vector<1x1xf32>
      %c0_63 = arith.constant 0 : index
      %c0_64 = arith.constant 0 : index
      %90 = vector.load %arg11[%c0_63, %c0_64] : memref<1x1xf32, #tpu.memory_space<vmem>>, vector<1x1xf32>
      tpu.vector_store %arg11[%c0_63, %c0_64], %89 {strides = array<i32>} : memref<1x1xf32, #tpu.memory_space<vmem>>, vector<1x1xf32>,
      %cst_65 = arith.constant 0.000000e+00 : f32
      %91 = vector.broadcast %cst_65 : f32 to vector<1x1xf32>
      %c0_66 = arith.constant 0 : index
      %c0_67 = arith.constant 0 : index
      %92 = vector.load %arg12[%c0_66, %c0_67] : memref<1x1xf32, #tpu.memory_space<vmem>>, vector<1x1xf32>
      tpu.vector_store %arg12[%c0_66, %c0_67], %91 {strides = array<i32>} : memref<1x1xf32, #tpu.memory_space<vmem>>, vector<1x1xf32>,
    } else {
    }
    %c0 = arith.constant 0 : index
    %c0_1 = arith.constant 0 : index
    %c0_2 = arith.constant 0 : index
    %3 = vector.load %arg2[%c0, %c0_1, %c0_2] : memref<2x200x8xbf16, #tpu.memory_space<vmem>>, vector<1x200x8xbf16>
    %4 = vector.shape_cast %3 : vector<1x200x8xbf16> to vector<200x8xbf16>
    %c0_3 = arith.constant 0 : index
    %c0_4 = arith.constant 0 : index
    %5 = vector.load %arg3[%c0_3, %c0_4] : memref<8x128xbf16, #tpu.memory_space<vmem>>, vector<8x128xbf16>
    %cst = arith.constant dense<0.000000e+00> : vector<200x128xf32>
    %6 = tpu.matmul %4, %5, %cst {dimension_numbers = #tpu.dot_dimension_numbers<[1], [0], [0], [1], [0, 0, 1, 1], [], []>} : vector<200x8xbf16>, vector<8x128xbf16>, vector<200x128xf32> -> vector<200x128xf32>
    %c0_5 = arith.constant 0 : index
    %c0_6 = arith.constant 0 : index
    %7 = vector.load %arg4[%c0_5, %c0_6] : memref<1x128xf32, #tpu.memory_space<vmem>>, vector<1x128xf32>
    %8 = vector.broadcast %7 : vector<1x128xf32> to vector<200x128xf32>
    %9 = arith.addf %6, %8 : vector<200x128xf32>
    %cst_7 = arith.constant 0.000000e+00 : f32
    %10 = vector.broadcast %cst_7 : f32 to vector<200x128xf32>
    %11 = arith.maximumf %9, %10 : vector<200x128xf32>
    %12 = arith.truncf %11 : vector<200x128xf32> to vector<200x128xbf16>
    %c0_8 = arith.constant 0 : index
    %c0_9 = arith.constant 0 : index
    %13 = vector.load %arg5[%c0_8, %c0_9] : memref<128x128xbf16, #tpu.memory_space<vmem>>, vector<128x128xbf16>
    %cst_10 = arith.constant dense<0.000000e+00> : vector<200x128xf32>
    %14 = tpu.matmul %12, %13, %cst_10 {dimension_numbers = #tpu.dot_dimension_numbers<[1], [0], [0], [1], [0, 0, 1, 1], [], []>} : vector<200x128xbf16>, vector<128x128xbf16>, vector<200x128xf32> -> vector<200x128xf32>
    %c0_11 = arith.constant 0 : index
    %c0_12 = arith.constant 0 : index
    %15 = vector.load %arg6[%c0_11, %c0_12] : memref<1x128xf32, #tpu.memory_space<vmem>>, vector<1x128xf32>
    %16 = vector.broadcast %15 : vector<1x128xf32> to vector<200x128xf32>
    %17 = arith.addf %14, %16 : vector<200x128xf32>
    %cst_13 = arith.constant 0.000000e+00 : f32
    %18 = vector.broadcast %cst_13 : f32 to vector<200x128xf32>
    %19 = arith.maximumf %17, %18 : vector<200x128xf32>
    %20 = arith.truncf %19 : vector<200x128xf32> to vector<200x128xbf16>
    %c0_14 = arith.constant 0 : index
    %c0_15 = arith.constant 0 : index
    %21 = vector.load %arg7[%c0_14, %c0_15] : memref<128x1xbf16, #tpu.memory_space<vmem>>, vector<128x1xbf16>
    %cst_16 = arith.constant dense<0.000000e+00> : vector<200x1xf32>
    %22 = tpu.matmul %20, %21, %cst_16 {dimension_numbers = #tpu.dot_dimension_numbers<[1], [0], [0], [1], [0, 0, 1, 1], [], []>} : vector<200x128xbf16>, vector<128x1xbf16>, vector<200x1xf32> -> vector<200x1xf32>
    %c0_17 = arith.constant 0 : index
    %c0_18 = arith.constant 0 : index
    %23 = vector.load %arg8[%c0_17, %c0_18] : memref<1x1xf32, #tpu.memory_space<vmem>>, vector<1x1xf32>
    %24 = vector.broadcast %23 : vector<1x1xf32> to vector<200x1xf32>
    %25 = arith.addf %22, %24 : vector<200x1xf32>
    %c1 = arith.constant 1 : index
    %c0_19 = arith.constant 0 : index
    %c0_20 = arith.constant 0 : index
    %26 = vector.load %arg2[%c1, %c0_19, %c0_20] : memref<2x200x8xbf16, #tpu.memory_space<vmem>>, vector<1x200x8xbf16>
    %27 = vector.shape_cast %26 : vector<1x200x8xbf16> to vector<200x8xbf16>
    %c0_21 = arith.constant 0 : index
    %c0_22 = arith.constant 0 : index
    %28 = vector.load %arg3[%c0_21, %c0_22] : memref<8x128xbf16, #tpu.memory_space<vmem>>, vector<8x128xbf16>
    %cst_23 = arith.constant dense<0.000000e+00> : vector<200x128xf32>
    %29 = tpu.matmul %27, %28, %cst_23 {dimension_numbers = #tpu.dot_dimension_numbers<[1], [0], [0], [1], [0, 0, 1, 1], [], []>} : vector<200x8xbf16>, vector<8x128xbf16>, vector<200x128xf32> -> vector<200x128xf32>
    %c0_24 = arith.constant 0 : index
    %c0_25 = arith.constant 0 : index
    %30 = vector.load %arg4[%c0_24, %c0_25] : memref<1x128xf32, #tpu.memory_space<vmem>>, vector<1x128xf32>
    %31 = vector.broadcast %30 : vector<1x128xf32> to vector<200x128xf32>
    %32 = arith.addf %29, %31 : vector<200x128xf32>
    %cst_26 = arith.constant 0.000000e+00 : f32
    %33 = vector.broadcast %cst_26 : f32 to vector<200x128xf32>
    %34 = arith.maximumf %32, %33 : vector<200x128xf32>
    %35 = arith.truncf %34 : vector<200x128xf32> to vector<200x128xbf16>
    %c0_27 = arith.constant 0 : index
    %c0_28 = arith.constant 0 : index
    %36 = vector.load %arg5[%c0_27, %c0_28] : memref<128x128xbf16, #tpu.memory_space<vmem>>, vector<128x128xbf16>
    %cst_29 = arith.constant dense<0.000000e+00> : vector<200x128xf32>
    %37 = tpu.matmul %35, %36, %cst_29 {dimension_numbers = #tpu.dot_dimension_numbers<[1], [0], [0], [1], [0, 0, 1, 1], [], []>} : vector<200x128xbf16>, vector<128x128xbf16>, vector<200x128xf32> -> vector<200x128xf32>
    %c0_30 = arith.constant 0 : index
    %c0_31 = arith.constant 0 : index
    %38 = vector.load %arg6[%c0_30, %c0_31] : memref<1x128xf32, #tpu.memory_space<vmem>>, vector<1x128xf32>
    %39 = vector.broadcast %38 : vector<1x128xf32> to vector<200x128xf32>
    %40 = arith.addf %37, %39 : vector<200x128xf32>
    %cst_32 = arith.constant 0.000000e+00 : f32
    %41 = vector.broadcast %cst_32 : f32 to vector<200x128xf32>
    %42 = arith.maximumf %40, %41 : vector<200x128xf32>
    %43 = arith.truncf %42 : vector<200x128xf32> to vector<200x128xbf16>
    %c0_33 = arith.constant 0 : index
    %c0_34 = arith.constant 0 : index
    %44 = vector.load %arg7[%c0_33, %c0_34] : memref<128x1xbf16, #tpu.memory_space<vmem>>, vector<128x1xbf16>
    %cst_35 = arith.constant dense<0.000000e+00> : vector<200x1xf32>
    %45 = tpu.matmul %43, %44, %cst_35 {dimension_numbers = #tpu.dot_dimension_numbers<[1], [0], [0], [1], [0, 0, 1, 1], [], []>} : vector<200x128xbf16>, vector<128x1xbf16>, vector<200x1xf32> -> vector<200x1xf32>
    %c0_36 = arith.constant 0 : index
    %c0_37 = arith.constant 0 : index
    %46 = vector.load %arg8[%c0_36, %c0_37] : memref<1x1xf32, #tpu.memory_space<vmem>>, vector<1x1xf32>
    %47 = vector.broadcast %46 : vector<1x1xf32> to vector<200x1xf32>
    %48 = arith.addf %45, %47 : vector<200x1xf32>
    %c1_i32 = arith.constant 1 : i32
    %49 = arith.muli %arg0, %c1_i32 : i32
    %50 = arith.addi %49, %arg1 : i32
    %51 = tpu.iota {dimensions = array<i32: 0>} : vector<200x1xi32>
    %c200_i32 = arith.constant 200 : i32
    %52 = arith.muli %50, %c200_i32 : i32
    %53 = vector.broadcast %52 : i32 to vector<200x1xi32>
    %54 = arith.addi %51, %53 : vector<200x1xi32>
    %c200_i32_38 = arith.constant 200 : i32
    %55 = vector.broadcast %c200_i32_38 : i32 to vector<200x1xi32>
    %56 = arith.cmpi slt, %54, %55 : vector<200x1xi32>
    %c0_39 = arith.constant 0 : index
    %c0_40 = arith.constant 0 : index
    %57 = vector.load %arg11[%c0_39, %c0_40] : memref<1x1xf32, #tpu.memory_space<vmem>>, vector<1x1xf32>
    %cst_41 = arith.constant -1.000000e+30 : f32
    %58 = vector.broadcast %cst_41 : f32 to vector<200x1xf32>
    %59 = arith.select %56, %48, %58 : vector<200x1xi1>, vector<200x1xf32>
    %cst_42 = arith.constant dense<0xFF800000> : vector<1xf32>
    %60 = vector.multi_reduction <maximumf>, %59, %cst_42 [0] : vector<200x1xf32> to vector<1xf32>
    %61 = vector.shape_cast %60 : vector<1xf32> to vector<1x1xf32>
    %62 = arith.maximumf %57, %61 : vector<1x1xf32>
    %63 = vector.broadcast %62 : vector<1x1xf32> to vector<200x1xf32>
    %64 = arith.subf %48, %63 : vector<200x1xf32>
    %65 = math.exp %64 : vector<200x1xf32>
    %cst_43 = arith.constant 0.000000e+00 : f32
    %66 = vector.broadcast %cst_43 : f32 to vector<200x1xf32>
    %67 = arith.select %56, %65, %66 : vector<200x1xi1>, vector<200x1xf32>
    %cst_44 = arith.constant dense<0.000000e+00> : vector<1xf32>
    %68 = vector.multi_reduction <add>, %67, %cst_44 [0] : vector<200x1xf32> to vector<1xf32>
    %69 = vector.shape_cast %68 : vector<1xf32> to vector<1x1xf32>
    %c0_45 = arith.constant 0 : index
    %c0_46 = arith.constant 0 : index
    %70 = vector.load %arg12[%c0_45, %c0_46] : memref<1x1xf32, #tpu.memory_space<vmem>>, vector<1x1xf32>
    %71 = arith.subf %57, %62 : vector<1x1xf32>
    %72 = math.exp %71 : vector<1x1xf32>
    %73 = arith.mulf %70, %72 : vector<1x1xf32>
    %74 = arith.addf %73, %69 : vector<1x1xf32>
    %c0_47 = arith.constant 0 : index
    %c0_48 = arith.constant 0 : index
    %75 = vector.load %arg12[%c0_47, %c0_48] : memref<1x1xf32, #tpu.memory_space<vmem>>, vector<1x1xf32>
    tpu.vector_store %arg12[%c0_47, %c0_48], %74 {strides = array<i32>} : memref<1x1xf32, #tpu.memory_space<vmem>>, vector<1x1xf32>,
    %c0_49 = arith.constant 0 : index
    %c0_50 = arith.constant 0 : index
    %76 = vector.load %arg11[%c0_49, %c0_50] : memref<1x1xf32, #tpu.memory_space<vmem>>, vector<1x1xf32>
    tpu.vector_store %arg11[%c0_49, %c0_50], %62 {strides = array<i32>} : memref<1x1xf32, #tpu.memory_space<vmem>>, vector<1x1xf32>,
    %c0_51 = arith.constant 0 : index
    %c0_52 = arith.constant 0 : index
    %77 = vector.load %arg10[%c0_51, %c0_52] : memref<1x1xf32, #tpu.memory_space<vmem>>, vector<1x1xf32>
    %cst_53 = arith.constant 0.000000e+00 : f32
    %78 = vector.broadcast %cst_53 : f32 to vector<200x1xf32>
    %79 = arith.select %56, %25, %78 : vector<200x1xi1>, vector<200x1xf32>
    %cst_54 = arith.constant dense<0.000000e+00> : vector<1xf32>
    %80 = vector.multi_reduction <add>, %79, %cst_54 [0] : vector<200x1xf32> to vector<1xf32>
    %81 = vector.shape_cast %80 : vector<1xf32> to vector<1x1xf32>
    %82 = arith.addf %77, %81 : vector<1x1xf32>
    %c0_55 = arith.constant 0 : index
    %c0_56 = arith.constant 0 : index
    %83 = vector.load %arg10[%c0_55, %c0_56] : memref<1x1xf32, #tpu.memory_space<vmem>>, vector<1x1xf32>
    tpu.vector_store %arg10[%c0_55, %c0_56], %82 {strides = array<i32>} : memref<1x1xf32, #tpu.memory_space<vmem>>, vector<1x1xf32>,
    %c0_i32_57 = arith.constant 0 : i32
    %84 = arith.cmpi eq, %arg1, %c0_i32_57 : i32
    %85 = arith.extui %84 : i1 to i32
    %c0_i32_58 = arith.constant 0 : i32
    %86 = arith.cmpi ne, %85, %c0_i32_58 : i32
    scf.if %86 {
      %c0_59 = arith.constant 0 : index
      %c0_60 = arith.constant 0 : index
      %87 = vector.load %arg10[%c0_59, %c0_60] : memref<1x1xf32, #tpu.memory_space<vmem>>, vector<1x1xf32>
      %88 = vector.shape_cast %87 : vector<1x1xf32> to vector<1x1x1xf32>
      %cst_61 = arith.constant dense<0.000000e+00> : vector<1xf32>
      %89 = vector.multi_reduction <add>, %88, %cst_61 [1, 2] : vector<1x1x1xf32> to vector<1xf32>
      %90 = vector.shape_cast %89 : vector<1xf32> to vector<1x1x1xf32>
      %91 = vector.extract %90[0, 0, 0] : f32 from vector<1x1x1xf32>
      %c0_62 = arith.constant 0 : index
      %c0_63 = arith.constant 0 : index
      %92 = memref.load %arg9[%c0_62, %c0_63] : memref<1x3xf32, #tpu.memory_space<smem>>
      memref.store %91, %arg9[%c0_62, %c0_63] : memref<1x3xf32, #tpu.memory_space<smem>>
      %c0_64 = arith.constant 0 : index
      %c0_65 = arith.constant 0 : index
      %93 = vector.load %arg11[%c0_64, %c0_65] : memref<1x1xf32, #tpu.memory_space<vmem>>, vector<1x1xf32>
      %94 = vector.shape_cast %93 : vector<1x1xf32> to vector<1x1x1xf32>
      %cst_66 = arith.constant dense<0.000000e+00> : vector<1xf32>
      %95 = vector.multi_reduction <add>, %94, %cst_66 [1, 2] : vector<1x1x1xf32> to vector<1xf32>
      %96 = vector.shape_cast %95 : vector<1xf32> to vector<1x1x1xf32>
      %97 = vector.extract %96[0, 0, 0] : f32 from vector<1x1x1xf32>
      %c0_67 = arith.constant 0 : index
      %c1_68 = arith.constant 1 : index
      %98 = memref.load %arg9[%c0_67, %c1_68] : memref<1x3xf32, #tpu.memory_space<smem>>
      memref.store %97, %arg9[%c0_67, %c1_68] : memref<1x3xf32, #tpu.memory_space<smem>>
      %c0_69 = arith.constant 0 : index
      %c0_70 = arith.constant 0 : index
      %99 = vector.load %arg12[%c0_69, %c0_70] : memref<1x1xf32, #tpu.memory_space<vmem>>, vector<1x1xf32>
      %100 = vector.shape_cast %99 : vector<1x1xf32> to vector<1x1x1xf32>
      %cst_71 = arith.constant dense<0.000000e+00> : vector<1xf32>
      %101 = vector.multi_reduction <add>, %100, %cst_71 [1, 2] : vector<1x1x1xf32> to vector<1xf32>
      %102 = vector.shape_cast %101 : vector<1xf32> to vector<1x1x1xf32>
      %103 = vector.extract %102[0, 0, 0] : f32 from vector<1x1x1xf32>
      %c0_72 = arith.constant 0 : index
      %c2 = arith.constant 2 : index
      %104 = memref.load %arg9[%c0_72, %c2] : memref<1x3xf32, #tpu.memory_space<smem>>
      memref.store %103, %arg9[%c0_72, %c2] : memref<1x3xf32, #tpu.memory_space<smem>>
    } else {
    }
    return
  }
  func.func @transform_0(%arg0: i32, %arg1: i32) -> (i32, i32, i32) {
    %c1_i32 = arith.constant 1 : i32
    %0 = arith.muli %arg0, %c1_i32 : i32
    %1 = arith.addi %0, %arg1 : i32
    %c0_i32 = arith.constant 0 : i32
    %2 = arith.minsi %1, %c0_i32 : i32
    %c0_i32_0 = arith.constant 0 : i32
    %c0_i32_1 = arith.constant 0 : i32
    %c0_i32_2 = arith.constant 0 : i32
    return %c0_i32_0, %2, %c0_i32_1 : i32, i32, i32
  }
  func.func @transform_1(%arg0: i32, %arg1: i32) -> (i32, i32) {
    %c0_i32 = arith.constant 0 : i32
    %c0_i32_0 = arith.constant 0 : i32
    %c0_i32_1 = arith.constant 0 : i32
    return %c0_i32, %c0_i32_0 : i32, i32
  }
  func.func @transform_2(%arg0: i32, %arg1: i32) -> (i32, i32) {
    %c0_i32 = arith.constant 0 : i32
    %c0_i32_0 = arith.constant 0 : i32
    %c0_i32_1 = arith.constant 0 : i32
    return %c0_i32, %c0_i32_0 : i32, i32
  }
  func.func @transform_3(%arg0: i32, %arg1: i32) -> (i32, i32) {
    %c0_i32 = arith.constant 0 : i32
    %c0_i32_0 = arith.constant 0 : i32
    %c0_i32_1 = arith.constant 0 : i32
    return %c0_i32, %c0_i32_0 : i32, i32
  }
  func.func @transform_4(%arg0: i32, %arg1: i32) -> (i32, i32) {
    %c0_i32 = arith.constant 0 : i32
    %c0_i32_0 = arith.constant 0 : i32
    %c0_i32_1 = arith.constant 0 : i32
    return %c0_i32, %c0_i32_0 : i32, i32
  }
  func.func @transform_5(%arg0: i32, %arg1: i32) -> (i32, i32) {
    %c0_i32 = arith.constant 0 : i32
    %c0_i32_0 = arith.constant 0 : i32
    %c0_i32_1 = arith.constant 0 : i32
    return %c0_i32, %c0_i32_0 : i32, i32
  }
  func.func @transform_6(%arg0: i32, %arg1: i32) -> (i32, i32) {
    %c0_i32 = arith.constant 0 : i32
    %c0_i32_0 = arith.constant 0 : i32
    %c0_i32_1 = arith.constant 0 : i32
    return %c0_i32, %c0_i32_0 : i32, i32
  }
  func.func @transform_7(%arg0: i32, %arg1: i32) -> (i32, i32) {
    %c0_i32 = arith.constant 0 : i32
    %c0_i32_0 = arith.constant 0 : i32
    return %arg0, %c0_i32 : i32, i32
  }
}

</mosaic_0001>

<bundles_post_ra>
// kernel: mine_pallas_call.1
= control target key start
LH: loop header
LB: loop body
LE: loop exit
PB: predicated region body
PF: predicated region fallthrough
CT: control target
= control target key end

     0   :  { %s3521_s0 = inlined_call_operand.vmem [shape: bf16[2,200,8], index: 0, kind: input, shape index: {}]   ;;  %s3522_s1 = inlined_call_operand.vmem [shape: bf16[8,128], index: 1, kind: input, shape index: {}]   ;;  %s3523_s2 = inlined_call_operand.vmem [shape: f32[1,128], index: 2, kind: input, shape index: {}]   ;;  %s3524_s3 = inlined_call_operand.vmem [shape: bf16[128,128], index: 3, kind: input, shape index: {}]   ;;  %s3525_s4 = inlined_call_operand.vmem [shape: f32[1,128], index: 4, kind: input, shape index: {}]   ;;  %s3526_s5 = inlined_call_operand.vmem [shape: bf16[128,1], index: 5, kind: input, shape index: {}]   ;;  %s3527_s6 = inlined_call_operand.<no memory space> [shape: f32[1,1], index: 6, kind: input, shape index: {}]   ;;  %s3528_s7 = inlined_call_operand.vmem [shape: f32[1,3], index: 7, kind: output, shape index: {}]  }
   0x1   :  { %v12_v0 = vstv %s3527_s6 }
   0x2   :  { %13 = vst [vmem:[#allocation5] sm:$0x1] %v12_v0 }
   0x3   :  { %v95_v1 = vld [vmem:[%s3522_s1] sm:$0xf]  ;;  %vm206_vm0 = vcmask 1043456   ;;  %v2626_v2 = vmov 0.0   ;;  %vm2627_vm1 = vmmov 0   ;;  %vm166_vm2 = vcmask 64512  }
   0x4   :  { %2110 = vmatprep.subr.bf16.mxu0 %v2626_v2  ;;  %v2677_v3 = vsel %vm206_vm0, %v95_v1, 0  ;;  %2112 = vmatprep.mubr.msk.bf16.mxu0 %vm2627_vm1, %v2626_v2  ;;  %v2516_v4 = vld [vmem:[%s3521_s0] sm:$0xff]   ;;  %v2517_v5 = vld [vmem:[%s3521_s0 + $0x8] sm:$0xff]   ;;  %v2518_v8 = vld [vmem:[%s3521_s0 + $0x10] sm:$0xff]  }
   0x5   :  { %2111 = vmatpush3.bf16.msra.mxu0 %v2677_v3  ;;  %2164 = vmatprep.subr.bf16.mxu1 %v2626_v2  ;;  %v2701_v6 = vld [vmem:[%s3524_s3] sm:$0xff]   ;;  %v2707_v7 = vld [vmem:[%s3524_s3 + $0x8] sm:$0xff]   ;;  %v2716_v9 = vld [vmem:[%s3524_s3 + $0x10] sm:$0xff]  }
   0x6   :  { %2180 = vmatprep.mubr.msk.bf16.mxu1 %vm2627_vm1, %v2626_v2  ;;  %2232 = vmatprep.subr.bf16.mxu0 %v2626_v2  ;;  %v2726_v10 = vld [vmem:[%s3524_s3 + $0x18] sm:$0xff]   ;;  %v2736_v12 = vld [vmem:[%s3524_s3 + $0x20] sm:$0xff]   ;;  %v2746_v13 = vld [vmem:[%s3524_s3 + $0x28] sm:$0xff]  }
   0x7   :  { %2165 = vmatpush3.bf16.msra.mxu1 %v2701_v6  ;;  %v2519_v11 = vld [vmem:[%s3521_s0 + $0x18] sm:$0xff]   ;;  %v2520_v14 = vld [vmem:[%s3521_s0 + $0x20] sm:$0xff]  }
   0x8   :  { %2113 = vmatmul.mubr.msk.bf16.vlgmr.msra.gmra.mrb[0].mxu0 %vm166_vm2, %v2516_v4  ;;  %2166 = vmatprep.subr.bf16.mxu1 %v2626_v2 }
   0x9   :  { %2116 = vmatprep.mubr.msk.bf16.mxu0 %vm2627_vm1, %v2626_v2 }
   0xb   :  { %2167 = vmatpush3.bf16.msra.mxu1 %v2707_v7 }
   0xc   :  { %2168 = vmatprep.subr.bf16.mxu1 %v2626_v2 }
   0xf   :  { %2169 = vmatpush3.bf16.msra.mxu1 %v2716_v9 }
  0x10   :  { %2117 = vmatmul.mubr.msk.bf16.gmra.mrb[4].mxu0 %vm166_vm2, %v2517_v5  ;;  %2170 = vmatprep.subr.bf16.mxu1 %v2626_v2 }
  0x11   :  { %2120 = vmatprep.mubr.msk.bf16.mxu0 %vm2627_vm1, %v2626_v2 }
  0x13   :  { %2171 = vmatpush3.bf16.msra.mxu1 %v2726_v10 }
  0x14   :  { %2172 = vmatprep.subr.bf16.mxu1 %v2626_v2 }
  0x17   :  { %2173 = vmatpush3.bf16.msra.mxu1 %v2736_v12 }
  0x18   :  { %2121 = vmatmul.mubr.msk.bf16.gmra.mrb[8].mxu0 %vm166_vm2, %v2518_v8  ;;  %2174 = vmatprep.subr.bf16.mxu1 %v2626_v2 }
  0x19   :  { %2124 = vmatprep.mubr.msk.bf16.mxu0 %vm2627_vm1, %v2626_v2 }
  0x20   :  { %2125 = vmatmul.mubr.msk.bf16.gmra.mrb[12].mxu0 %vm166_vm2, %v2519_v11 }
  0x21   :  { %2128 = vmatprep.mubr.msk.bf16.mxu0 %vm2627_vm1, %v2626_v2 }
  0x22   :  { %14 = vsyncpa [#allocation7], 0  ;;  %2175 = vmatpush3.bf16.msra.mxu1 %v2746_v13  ;;  %v2521_v15 = vld [vmem:[%s3521_s0 + $0x28] sm:$0xff]   ;;  %v2522_v16 = vld [vmem:[%s3521_s0 + $0x30] sm:$0xff]   ;;  %vm66_vm3 = vcmask 0   ;;  %vm1553_vm4 = vcmask 7168  }
  0x23   :  { %2176 = vmatprep.subr.bf16.mxu1 %v2626_v2  ;;  %v2523_v17 = vld [vmem:[%s3521_s0 + $0x38] sm:$0xff]   ;;  %v2524_v18 = vld [vmem:[%s3521_s0 + $0x40] sm:$0xff]   ;;  %v2525_v19 = vld [vmem:[%s3521_s0 + $0x48] sm:$0xff]   ;;  %67 = vst.msk [vmem:[#allocation2] sm:$0x1] %vm66_vm3, %v2626_v2  ;;  %s1887_s17 = sshll.u32 %s3528_s7, 4  ;;  %s1888_s17 = int_to_ptr.vmem [resolvable:$true] %s1887_s17 }
  0x24   :  { %v2526_v20 = vld [vmem:[%s3521_s0 + $0x50] sm:$0xff]   ;;  %v2527_v22 = vld [vmem:[%s3521_s0 + $0x58] sm:$0xff]   ;;  %v2528_v24 = vld [vmem:[%s3521_s0 + $0x60] ss:$0 sps:$4 sm:$0xff]   ;;  %69 = vst.msk [vmem:[#allocation4] sm:$0x1] %vm66_vm3, %v2626_v2  ;;  %p2617_p1 = scmp.lt.s32.totalorder %s1888_s17, %s1888_s17 }
  0x25   :  { %v2797_v21 = vld [vmem:[%s3524_s3 + $0x30] sm:$0xff]   ;;  %v2807_v23 = vld [vmem:[%s3524_s3 + $0x38] sm:$0xff]   ;;  %v2823_v25 = vld [vmem:[%s3526_s5] sm:$0xff]   ;;  %s2612_s19 = scalar_lea.vmem %s1888_s17, 16 }
  0x26   :  { %2177 = vmatpush3.bf16.msra.mxu1 %v2797_v21  ;;  %2233 = vmatpush3.bf16.msra.mxu0 %v2823_v25  ;;  %v2830_v26 = vld [vmem:[%s3523_s2] ss:$0 sm:$0xff]  ;;  %v2838_v39 = vld [vmem:[%s3526_s5 + $0x8] sm:$0xff]   ;;  %v2851_v49 = vld [vmem:[%s3526_s5 + $0x10] sm:$0xff]   ;;  %p2613_p0 = scmp.ne.s32.totalorder %s1888_s17, %s2612_s19  ;;  %p2618_p2 = scmp.lt.s32.totalorder %s2612_s19, %s2612_s19 }
  0x27   :  { %2178 = vmatprep.subr.bf16.mxu1 %v2626_v2  ;;  %2234 = vmatprep.subr.bf16.mxu0 %v2626_v2  ;;  %v2866_v5 = vld [vmem:[%s3526_s5 + $0x18] sm:$0xff]  }
  0x28   :  { %2129 = vmatmul.mubr.msk.bf16.gmra.mrb[16].mxu0 %vm166_vm2, %v2520_v14  ;;  %p2619_p3 = por %p2618_p2, %p2617_p1 }
  0x29   :  { %2132 = vmatprep.mubr.msk.bf16.mxu0 %vm2627_vm1, %v2626_v2 }
  0x2a   :  { %2179 = vmatpush3.bf16.msra.mxu1 %v2807_v23  ;;  %2235 = vmatpush3.bf16.msra.mxu0 %v2838_v39  ;;  %p2620_p4 = pnand %p2619_p3, %p2613_p0 }
  0x2b   :  { %2300 = vmatprep.subr.bf16.mxu1 %v2626_v2  ;;  %2236 = vmatprep.subr.bf16.mxu0 %v2626_v2 }
  0x2e   :  { %2237 = vmatpush3.bf16.msra.mxu0 %v2851_v49 }
  0x2f   :  { %2238 = vmatprep.subr.bf16.mxu0 %v2626_v2 }
  0x30   :  { %2133 = vmatmul.mubr.msk.bf16.gmra.mrb[20].mxu0 %vm166_vm2, %v2521_v15 }
  0x31   :  { %2136 = vmatprep.mubr.msk.bf16.mxu0 %vm2627_vm1, %v2626_v2 }
  0x32   :  { %2239 = vmatpush3.bf16.msra.mxu0 %v2866_v5 }
  0x33   :  { %2240 = vmatprep.subr.bf16.mxu0 %v2626_v2 }
  0x38   :  { %2137 = vmatmul.mubr.msk.bf16.gmra.mrb[24].mxu0 %vm166_vm2, %v2522_v16 }
  0x39   :  { %2140 = vmatprep.mubr.msk.bf16.mxu0 %vm2627_vm1, %v2626_v2 }
  0x40   :  { %2141 = vmatmul.mubr.msk.bf16.gmra.mrb[28].mxu0 %vm166_vm2, %v2523_v17 }
  0x41   :  { %2144 = vmatprep.mubr.msk.bf16.mxu0 %vm2627_vm1, %v2626_v2 }
  0x48   :  { %2145 = vmatmul.mubr.msk.bf16.gmra.mrb[32].mxu0 %vm166_vm2, %v2524_v18 }
  0x49   :  { %2148 = vmatprep.mubr.msk.bf16.mxu0 %vm2627_vm1, %v2626_v2 }
  0x50   :  { %2149 = vmatmul.mubr.msk.bf16.gmra.mrb[36].mxu0 %vm166_vm2, %v2525_v19 }
  0x51   :  { %2152 = vmatprep.mubr.msk.bf16.mxu0 %vm2627_vm1, %v2626_v2 }
  0x58   :  { %2153 = vmatmul.mubr.msk.bf16.gmra.mrb[40].mxu0 %vm166_vm2, %v2526_v20 }
  0x59   :  { %2156 = vmatprep.mubr.msk.bf16.mxu0 %vm2627_vm1, %v2626_v2 }
  0x60   :  { %2157 = vmatmul.mubr.msk.bf16.gmra.mrb[44].mxu0 %vm166_vm2, %v2527_v22 }
  0x61   :  { %2160 = vmatprep.mubr.msk.bf16.mxu0 %vm2627_vm1, %v2626_v2 }
  0x68   :  { %2161 = vmatmul.mubr.msk.bf16.gmra.mrb[48].mxu0 %vm166_vm2, %v2528_v24  ;;  %v2879_v24 = vld [vmem:[%s3526_s5 + $0x20] sm:$0xff]  }
  0x69   :  { %2248 = vmatprep.mubr.msk.bf16.mxu0 %vm2627_vm1, %v2626_v2  ;;  %2241 = vmatpush3.bf16.msra.mxu0 %v2879_v24 }
  0x6a   :  { %2242 = vmatprep.subr.bf16.mxu0 %v2626_v2 }
  0xdb   :  { %v244_v27 = vpop.f32.mrb[0].mxu0 }
  0xdc   :  { %v245_v28 = vadd.f32 %v2830_v26, %v244_v27  ;;  %v2114_v29 = vpop.f32.mrb[1].mxu0 }
  0xdd   :  { %v247_v30 = vpop.f32.mrb[2].mxu0 }
  0xde   :  { %v248_v31 = vadd.f32 %v2830_v26, %v247_v30  ;;  %v2115_v32 = vpop.f32.mrb[3].mxu0  ;;  %v346_v33 = vmax.f32 %v245_v28, 0.0 }
  0xe0   :  { %v347_v34 = vmax.f32 %v248_v31, 0.0 }
  0xe2   :  { %v371_v35 = vpack.c.bf16 %v347_v34, %v346_v33 }
  0xe3   :  { %v252_v36 = vpop.f32.mrb[4].mxu0 }
  0xe4   :  { %v253_v37 = vadd.f32 %v2830_v26, %v252_v36  ;;  %v2118_v38 = vpop.f32.mrb[5].mxu0  ;;  %2181 = vmatmul.mubr.bf16.vlgmr.msra.gmra.mrb[0].mxu1 %v371_v35 }
  0xe5   :  { %2301 = vmatpush3.bf16.msra.mxu1 %v2677_v3  ;;  %v255_v40 = vpop.f32.mrb[6].mxu0  ;;  %2184 = vmatprep.mubr.msk.bf16.mxu1 %vm2627_vm1, %v2626_v2 }
  0xe6   :  { %v256_v41 = vadd.f32 %v2830_v26, %v255_v40  ;;  %v2119_v42 = vpop.f32.mrb[7].mxu0  ;;  %2490 = vmatprep.subr.bf16.mxu1 %v2626_v2  ;;  %v348_v43 = vmax.f32 %v253_v37, 0.0 }
  0xe8   :  { %v349_v44 = vmax.f32 %v256_v41, 0.0 }
  0xea   :  { %v372_v45 = vpack.c.bf16 %v349_v44, %v348_v43 }
  0xeb   :  { %v260_v46 = vpop.f32.mrb[8].mxu0 }
  0xec   :  { %v261_v47 = vadd.f32 %v2830_v26, %v260_v46  ;;  %v2122_v48 = vpop.f32.mrb[9].mxu0  ;;  %2185 = vmatmul.mubr.bf16.gmra.mrb[4].mxu1 %v372_v45  ;;  %v2892_v45 = vld [vmem:[%s3526_s5 + $0x28] sm:$0xff]  }
  0xed   :  { %v263_v50 = vpop.f32.mrb[10].mxu0  ;;  %2188 = vmatprep.mubr.msk.bf16.mxu1 %vm2627_vm1, %v2626_v2  ;;  %2243 = vmatpush3.bf16.msra.mxu0 %v2892_v45 }
  0xee   :  { %v264_v51 = vadd.f32 %v2830_v26, %v263_v50  ;;  %v2123_v52 = vpop.f32.mrb[11].mxu0  ;;  %v350_v53 = vmax.f32 %v261_v47, 0.0  ;;  %2244 = vmatprep.subr.bf16.mxu0 %v2626_v2 }
  0xf0   :  { %v351_v54 = vmax.f32 %v264_v51, 0.0 }
  0xf2   :  { %v373_v55 = vpack.c.bf16 %v351_v54, %v350_v53 }
  0xf3   :  { %v268_v56 = vpop.f32.mrb[12].mxu0 }
  0xf4   :  { %v269_v57 = vadd.f32 %v2830_v26, %v268_v56  ;;  %v2126_v58 = vpop.f32.mrb[13].mxu0  ;;  %2189 = vmatmul.mubr.bf16.gmra.mrb[8].mxu1 %v373_v55 }
  0xf5   :  { %v271_v59 = vpop.f32.mrb[14].mxu0  ;;  %2192 = vmatprep.mubr.msk.bf16.mxu1 %vm2627_vm1, %v2626_v2 }
  0xf6   :  { %v272_v60 = vadd.f32 %v2830_v26, %v271_v59  ;;  %v2127_v61 = vpop.f32.mrb[15].mxu0  ;;  %v352_v62 = vmax.f32 %v269_v57, 0.0 }
  0xf8   :  { %v353_v63 = vmax.f32 %v272_v60, 0.0 }
  0xfa   :  { %v374_v0 = vpack.c.bf16 %v353_v63, %v352_v62 }
  0xfb   :  { %v276_v1 = vpop.f32.mrb[16].mxu0 }
  0xfc   :  { %v277_v3 = vadd.f32 %v2830_v26, %v276_v1  ;;  %v2130_v4 = vpop.f32.mrb[17].mxu0  ;;  %2193 = vmatmul.mubr.bf16.gmra.mrb[12].mxu1 %v374_v0  ;;  %v2907_v1 = vld [vmem:[%s3526_s5 + $0x30] sm:$0xff]  }
  0xfd   :  { %v279_v8 = vpop.f32.mrb[18].mxu0  ;;  %2196 = vmatprep.mubr.msk.bf16.mxu1 %vm2627_vm1, %v2626_v2  ;;  %2245 = vmatpush3.bf16.msra.mxu0 %v2907_v1 }
  0xfe   :  { %v280_v11 = vadd.f32 %v2830_v26, %v279_v8  ;;  %v2131_v14 = vpop.f32.mrb[19].mxu0  ;;  %v354_v15 = vmax.f32 %v277_v3, 0.0  ;;  %2246 = vmatprep.subr.bf16.mxu0 %v2626_v2 }
 0x100   :  { %v355_v16 = vmax.f32 %v280_v11, 0.0 }
 0x102   :  { %v375_v17 = vpack.c.bf16 %v355_v16, %v354_v15 }
 0x103   :  { %v284_v18 = vpop.f32.mrb[20].mxu0 }
 0x104   :  { %v285_v19 = vadd.f32 %v2830_v26, %v284_v18  ;;  %v2134_v20 = vpop.f32.mrb[21].mxu0  ;;  %2197 = vmatmul.mubr.bf16.gmra.mrb[16].mxu1 %v375_v17 }
 0x105   :  { %v287_v22 = vpop.f32.mrb[22].mxu0  ;;  %2200 = vmatprep.mubr.msk.bf16.mxu1 %vm2627_vm1, %v2626_v2 }
 0x106   :  { %v288_v27 = vadd.f32 %v2830_v26, %v287_v22  ;;  %v2135_v28 = vpop.f32.mrb[23].mxu0  ;;  %v356_v29 = vmax.f32 %v285_v19, 0.0  ;;  %v2918_v19 = vld [vmem:[%s3526_s5 + $0x38] sm:$0xff]  }
 0x107   :  { %2247 = vmatpush3.bf16.msra.mxu0 %v2918_v19 }
 0x108   :  { %v357_v30 = vmax.f32 %v288_v27, 0.0  ;;  %2354 = vmatprep.subr.bf16.mxu0 %v2626_v2 }
 0x10a   :  { %v376_v31 = vpack.c.bf16 %v357_v30, %v356_v29 }
 0x10b   :  { %v292_v32 = vpop.f32.mrb[24].mxu0 }
 0x10c   :  { %v293_v33 = vadd.f32 %v2830_v26, %v292_v32  ;;  %v2138_v34 = vpop.f32.mrb[25].mxu0  ;;  %2201 = vmatmul.mubr.bf16.gmra.mrb[20].mxu1 %v376_v31 }
 0x10d   :  { %v295_v35 = vpop.f32.mrb[26].mxu0  ;;  %2204 = vmatprep.mubr.msk.bf16.mxu1 %vm2627_vm1, %v2626_v2 }
 0x10e   :  { %v296_v36 = vadd.f32 %v2830_v26, %v295_v35  ;;  %v2139_v37 = vpop.f32.mrb[27].mxu0  ;;  %v358_v38 = vmax.f32 %v293_v33, 0.0 }
 0x110   :  { %v359_v40 = vmax.f32 %v296_v36, 0.0 }
 0x112   :  { %v377_v41 = vpack.c.bf16 %v359_v40, %v358_v38 }
 0x113   :  { %v300_v42 = vpop.f32.mrb[28].mxu0 }
 0x114   :  { %v301_v43 = vadd.f32 %v2830_v26, %v300_v42  ;;  %v2142_v44 = vpop.f32.mrb[29].mxu0  ;;  %2205 = vmatmul.mubr.bf16.gmra.mrb[24].mxu1 %v377_v41 }
 0x115   :  { %v303_v46 = vpop.f32.mrb[30].mxu0  ;;  %2208 = vmatprep.mubr.msk.bf16.mxu1 %vm2627_vm1, %v2626_v2 }
 0x116   :  { %v304_v47 = vadd.f32 %v2830_v26, %v303_v46  ;;  %v2143_v48 = vpop.f32.mrb[31].mxu0  ;;  %v360_v50 = vmax.f32 %v301_v43, 0.0 }
 0x118   :  { %v361_v51 = vmax.f32 %v304_v47, 0.0 }
 0x11a   :  { %v378_v52 = vpack.c.bf16 %v361_v51, %v360_v50  ;;  %v2537_v50 = vld [vmem:[%s3521_s0 + $0x64] sm:$0xff]   ;;  %v2538_v51 = vld [vmem:[%s3521_s0 + $0x6c] sm:$0xff]  }
 0x11b   :  { %v308_v53 = vpop.f32.mrb[32].mxu0 }
 0x11c   :  { %v309_v54 = vadd.f32 %v2830_v26, %v308_v53  ;;  %v2146_v55 = vpop.f32.mrb[33].mxu0  ;;  %2209 = vmatmul.mubr.bf16.gmra.mrb[28].mxu1 %v378_v52  ;;  %v2540_v52 = vld [vmem:[%s3521_s0 + $0x74] sm:$0xff]   ;;  %v2541_v53 = vld [vmem:[%s3521_s0 + $0x7c] sm:$0xff]  }
 0x11d   :  { %v311_v56 = vpop.f32.mrb[34].mxu0  ;;  %2212 = vmatprep.mubr.msk.bf16.mxu1 %vm2627_vm1, %v2626_v2  ;;  %v2545_v55 = vld [vmem:[%s3521_s0 + $0x8c] sm:$0xff]  }
 0x11e   :  { %v312_v57 = vadd.f32 %v2830_v26, %v311_v56  ;;  %v2147_v58 = vpop.f32.mrb[35].mxu0  ;;  %v362_v59 = vmax.f32 %v309_v54, 0.0  ;;  %v2543_v54 = vld [vmem:[%s3521_s0 + $0x84] sm:$0xff]   ;;  %v2546_v56 = vld [vmem:[%s3521_s0 + $0x94] sm:$0xff]  }
 0x11f   :  { %v2550_v58 = vld [vmem:[%s3521_s0 + $0xa4] sm:$0xff]  }
 0x120   :  { %v363_v60 = vmax.f32 %v312_v57, 0.0  ;;  %v2548_v57 = vld [vmem:[%s3521_s0 + $0x9c] sm:$0xff]  }
 0x122   :  { %v379_v61 = vpack.c.bf16 %v363_v60, %v362_v59  ;;  %v2551_v59 = vld [vmem:[%s3521_s0 + $0xac] sm:$0xff]   ;;  %v2553_v60 = vld [vmem:[%s3521_s0 + $0xb4] sm:$0xff]  }
 0x123   :  { %v316_v62 = vpop.f32.mrb[36].mxu0 }
 0x124   :  { %v317_v63 = vadd.f32 %v2830_v26, %v316_v62  ;;  %v2150_v0 = vpop.f32.mrb[37].mxu0  ;;  %2213 = vmatmul.mubr.bf16.gmra.mrb[32].mxu1 %v379_v61  ;;  %v2554_v61 = vld [vmem:[%s3521_s0 + $0xbc] sm:$0xff]   ;;  %v2556_v62 = vld [vmem:[%s3521_s0 + $0xc4] ss:$0 sps:$4 sm:$0xff]  }
 0x125   :  { %v319_v3 = vpop.f32.mrb[38].mxu0  ;;  %2216 = vmatprep.mubr.msk.bf16.mxu1 %vm2627_vm1, %v2626_v2 }
 0x126   :  { %v320_v4 = vadd.f32 %v2830_v26, %v319_v3  ;;  %v2151_v8 = vpop.f32.mrb[39].mxu0  ;;  %v364_v11 = vmax.f32 %v317_v63, 0.0  ;;  %v3030_v63 = vld [vmem:[%s3525_s4] ss:$0 sm:$0xff] }
 0x128   :  { %v365_v14 = vmax.f32 %v320_v4, 0.0 }
 0x12a   :  { %v380_v15 = vpack.c.bf16 %v365_v14, %v364_v11 }
 0x12b   :  { %v324_v16 = vpop.f32.mrb[40].mxu0 }
 0x12c   :  { %v325_v17 = vadd.f32 %v2830_v26, %v324_v16  ;;  %v2154_v18 = vpop.f32.mrb[41].mxu0  ;;  %2217 = vmatmul.mubr.bf16.gmra.mrb[36].mxu1 %v380_v15 }
 0x12d   :  { %v327_v20 = vpop.f32.mrb[42].mxu0  ;;  %2220 = vmatprep.mubr.msk.bf16.mxu1 %vm2627_vm1, %v2626_v2 }
 0x12e   :  { %v328_v22 = vadd.f32 %v2830_v26, %v327_v20  ;;  %v2155_v27 = vpop.f32.mrb[43].mxu0  ;;  %v366_v28 = vmax.f32 %v325_v17, 0.0 }
 0x130   :  { %v367_v29 = vmax.f32 %v328_v22, 0.0 }
 0x132   :  { %v381_v30 = vpack.c.bf16 %v367_v29, %v366_v28 }
 0x133   :  { %v332_v31 = vpop.f32.mrb[44].mxu0 }
 0x134   :  { %v333_v32 = vadd.f32 %v2830_v26, %v332_v31  ;;  %v2158_v33 = vpop.f32.mrb[45].mxu0  ;;  %2221 = vmatmul.mubr.bf16.gmra.mrb[40].mxu1 %v381_v30 }
 0x135   :  { %v335_v34 = vpop.f32.mrb[46].mxu0  ;;  %2224 = vmatprep.mubr.msk.bf16.mxu1 %vm2627_vm1, %v2626_v2 }
 0x136   :  { %v336_v35 = vadd.f32 %v2830_v26, %v335_v34  ;;  %v2159_v36 = vpop.f32.mrb[47].mxu0  ;;  %v368_v37 = vmax.f32 %v333_v32, 0.0 }
 0x138   :  { %v369_v38 = vmax.f32 %v336_v35, 0.0 }
 0x13a   :  { %v382_v40 = vpack.c.bf16 %v369_v38, %v368_v37 }
 0x13b   :  { %v340_v41 = vpop.f32.mrb[48].mxu0 }
 0x13c   :  { %v341_v42 = vadd.f32 %v2830_v26, %v340_v41  ;;  %v2162_v43 = vpop.f32.mrb[49].mxu0  ;;  %2225 = vmatmul.mubr.bf16.gmra.mrb[44].mxu1 %v382_v40 }
 0x13d   :  { %v343_v44 = vpop.f32.mrb[50].mxu0  ;;  %2228 = vmatprep.mubr.msk.bf16.mxu1 %vm2627_vm1, %v2626_v2 }
 0x13e   :  { %v370_v46 = vmax.f32 %v341_v42, 0.0  ;;  %v2163_v47 = vpop.f32.mrb[51].mxu0 }
 0x140   :  { %v383_v48 = vpack.c.bf16 %v370_v46, %v370_v46 }
 0x144   :  { %2229 = vmatmul.mubr.bf16.gmra.mrb[48].mxu1 %v383_v48 }
 0x145   :  { %2302 = vmatprep.mubr.msk.bf16.mxu1 %vm2627_vm1, %v2626_v2 }
 0x14c   :  { %2303 = vmatmul.mubr.msk.bf16.vlgmr.msra.gmra.mrb[52].mxu1 %vm166_vm2, %v2537_v50 }
 0x14d   :  { %2306 = vmatprep.mubr.msk.bf16.mxu1 %vm2627_vm1, %v2626_v2  ;;  %2498 = vmatpush3.bf16.msra.mxu1 %v2823_v25 }
 0x14e   :  { %2491 = vmatprep.subr.bf16.mxu1 %v2626_v2 }
 0x151   :  { %2499 = vmatpush3.bf16.msra.mxu1 %v2838_v39 }
 0x152   :  { %2492 = vmatprep.subr.bf16.mxu1 %v2626_v2 }
 0x154   :  { %2307 = vmatmul.mubr.msk.bf16.gmra.mrb[56].mxu1 %vm166_vm2, %v2538_v51 }
 0x155   :  { %2310 = vmatprep.mubr.msk.bf16.mxu1 %vm2627_vm1, %v2626_v2  ;;  %2500 = vmatpush3.bf16.msra.mxu1 %v2851_v49 }
 0x156   :  { %2493 = vmatprep.subr.bf16.mxu1 %v2626_v2 }
 0x159   :  { %2501 = vmatpush3.bf16.msra.mxu1 %v2866_v5 }
 0x15a   :  { %2494 = vmatprep.subr.bf16.mxu1 %v2626_v2 }
 0x15c   :  { %2311 = vmatmul.mubr.msk.bf16.gmra.mrb[60].mxu1 %vm166_vm2, %v2540_v52 }
 0x15d   :  { %2314 = vmatprep.mubr.msk.bf16.mxu1 %vm2627_vm1, %v2626_v2  ;;  %2502 = vmatpush3.bf16.msra.mxu1 %v2879_v24 }
 0x15e   :  { %2495 = vmatprep.subr.bf16.mxu1 %v2626_v2 }
 0x161   :  { %2503 = vmatpush3.bf16.msra.mxu1 %v2892_v45 }
 0x162   :  { %2496 = vmatprep.subr.bf16.mxu1 %v2626_v2 }
 0x164   :  { %2315 = vmatmul.mubr.msk.bf16.gmra.mrb[64].mxu1 %vm166_vm2, %v2541_v53 }
 0x165   :  { %2318 = vmatprep.mubr.msk.bf16.mxu1 %vm2627_vm1, %v2626_v2  ;;  %2504 = vmatpush3.bf16.msra.mxu1 %v2907_v1 }
 0x166   :  { %2497 = vmatprep.subr.bf16.mxu1 %v2626_v2 }
 0x169   :  { %2505 = vmatpush3.bf16.msra.mxu1 %v2918_v19 }
 0x16c   :  { %2319 = vmatmul.mubr.msk.bf16.gmra.mrb[68].mxu1 %vm166_vm2, %v2543_v54 }
 0x16d   :  { %2322 = vmatprep.mubr.msk.bf16.mxu1 %vm2627_vm1, %v2626_v2 }
 0x174   :  { %2323 = vmatmul.mubr.msk.bf16.gmra.mrb[72].mxu1 %vm166_vm2, %v2545_v55 }
 0x175   :  { %2326 = vmatprep.mubr.msk.bf16.mxu1 %vm2627_vm1, %v2626_v2 }
 0x17c   :  { %2327 = vmatmul.mubr.msk.bf16.gmra.mrb[76].mxu1 %vm166_vm2, %v2546_v56 }
 0x17d   :  { %2330 = vmatprep.mubr.msk.bf16.mxu1 %vm2627_vm1, %v2626_v2 }
 0x184   :  { %2331 = vmatmul.mubr.msk.bf16.gmra.mrb[80].mxu1 %vm166_vm2, %v2548_v57 }
 0x185   :  { %2334 = vmatprep.mubr.msk.bf16.mxu1 %vm2627_vm1, %v2626_v2 }
 0x18c   :  { %2335 = vmatmul.mubr.msk.bf16.gmra.mrb[84].mxu1 %vm166_vm2, %v2550_v58 }
 0x18d   :  { %2338 = vmatprep.mubr.msk.bf16.mxu1 %vm2627_vm1, %v2626_v2 }
 0x194   :  { %2339 = vmatmul.mubr.msk.bf16.gmra.mrb[88].mxu1 %vm166_vm2, %v2551_v59 }
 0x195   :  { %2342 = vmatprep.mubr.msk.bf16.mxu1 %vm2627_vm1, %v2626_v2 }
 0x19c   :  { %2343 = vmatmul.mubr.msk.bf16.gmra.mrb[92].mxu1 %vm166_vm2, %v2553_v60 }
 0x19d   :  { %2346 = vmatprep.mubr.msk.bf16.mxu1 %vm2627_vm1, %v2626_v2 }
 0x1a4   :  { %2347 = vmatmul.mubr.msk.bf16.gmra.mrb[96].mxu1 %vm166_vm2, %v2554_v61 }
 0x1a5   :  { %2350 = vmatprep.mubr.msk.bf16.mxu1 %vm2627_vm1, %v2626_v2 }
 0x1ac   :  { %2351 = vmatmul.mubr.msk.bf16.gmra.mrb[100].mxu1 %vm166_vm2, %v2556_v62 }
 0x1ad   :  { %2442 = vmatprep.mubr.msk.bf16.mxu1 %vm2627_vm1, %v2626_v2 }
 0x1b7   :  { %v489_v0 = vpop.f32.mrb[0].mxu1 }
 0x1b8   :  { %v490_v3 = vadd.f32 %v3030_v63, %v489_v0  ;;  %v2182_v4 = vpop.f32.mrb[1].mxu1 }
 0x1b9   :  { %v492_v8 = vpop.f32.mrb[2].mxu1 }
 0x1ba   :  { %v493_v11 = vadd.f32 %v3030_v63, %v492_v8  ;;  %v2183_v14 = vpop.f32.mrb[3].mxu1  ;;  %v591_v15 = vmax.f32 %v490_v3, 0.0 }
 0x1bc   :  { %v592_v16 = vmax.f32 %v493_v11, 0.0 }
 0x1be   :  { %v616_v17 = vpack.c.bf16 %v592_v16, %v591_v15 }
 0x1bf   :  { %v497_v18 = vpop.f32.mrb[4].mxu1 }
 0x1c0   :  { %v498_v20 = vadd.f32 %v3030_v63, %v497_v18  ;;  %v2186_v22 = vpop.f32.mrb[5].mxu1  ;;  %2249 = vmatmul.mubr.bf16.vlgmr.msra.gmra.mrb[52].mxu0 %v616_v17 }
 0x1c1   :  { %2355 = vmatpush3.bf16.msra.mxu0 %v2701_v6  ;;  %v500_v27 = vpop.f32.mrb[6].mxu1  ;;  %2252 = vmatprep.mubr.msk.bf16.mxu0 %vm2627_vm1, %v2626_v2 }
 0x1c2   :  { %v501_v28 = vadd.f32 %v3030_v63, %v500_v27  ;;  %v2187_v29 = vpop.f32.mrb[7].mxu1  ;;  %2356 = vmatprep.subr.bf16.mxu0 %v2626_v2  ;;  %v593_v30 = vmax.f32 %v498_v20, 0.0 }
 0x1c4   :  { %v594_v31 = vmax.f32 %v501_v28, 0.0 }
 0x1c5   :  { %2357 = vmatpush3.bf16.msra.mxu0 %v2707_v7 }
 0x1c6   :  { %v617_v32 = vpack.c.bf16 %v594_v31, %v593_v30  ;;  %2358 = vmatprep.subr.bf16.mxu0 %v2626_v2 }
 0x1c7   :  { %v505_v33 = vpop.f32.mrb[8].mxu1 }
 0x1c8   :  { %v506_v34 = vadd.f32 %v3030_v63, %v505_v33  ;;  %v2190_v6 = vpop.f32.mrb[9].mxu1  ;;  %2253 = vmatmul.mubr.bf16.gmra.mrb[56].mxu0 %v617_v32 }
 0x1c9   :  { %v508_v35 = vpop.f32.mrb[10].mxu1  ;;  %2256 = vmatprep.mubr.msk.bf16.mxu0 %vm2627_vm1, %v2626_v2  ;;  %2359 = vmatpush3.bf16.msra.mxu0 %v2716_v9 }
 0x1ca   :  { %v509_v36 = vadd.f32 %v3030_v63, %v508_v35  ;;  %v2191_v37 = vpop.f32.mrb[11].mxu1  ;;  %2360 = vmatprep.subr.bf16.mxu0 %v2626_v2  ;;  %v595_v7 = vmax.f32 %v506_v34, 0.0 }
 0x1cc   :  { %v596_v38 = vmax.f32 %v509_v36, 0.0 }
 0x1cd   :  { %2361 = vmatpush3.bf16.msra.mxu0 %v2726_v10 }
 0x1ce   :  { %v618_v40 = vpack.c.bf16 %v596_v38, %v595_v7  ;;  %2362 = vmatprep.subr.bf16.mxu0 %v2626_v2 }
 0x1cf   :  { %v513_v41 = vpop.f32.mrb[12].mxu1 }
 0x1d0   :  { %v514_v42 = vadd.f32 %v3030_v63, %v513_v41  ;;  %v2194_v43 = vpop.f32.mrb[13].mxu1  ;;  %2257 = vmatmul.mubr.bf16.gmra.mrb[60].mxu0 %v618_v40 }
 0x1d1   :  { %v516_v44 = vpop.f32.mrb[14].mxu1  ;;  %2260 = vmatprep.mubr.msk.bf16.mxu0 %vm2627_vm1, %v2626_v2  ;;  %2363 = vmatpush3.bf16.msra.mxu0 %v2736_v12 }
 0x1d2   :  { %v517_v9 = vadd.f32 %v3030_v63, %v516_v44  ;;  %v2195_v46 = vpop.f32.mrb[15].mxu1  ;;  %2364 = vmatprep.subr.bf16.mxu0 %v2626_v2  ;;  %v597_v10 = vmax.f32 %v514_v42, 0.0 }
 0x1d4   :  { %v598_v47 = vmax.f32 %v517_v9, 0.0 }
 0x1d5   :  { %2365 = vmatpush3.bf16.msra.mxu0 %v2746_v13 }
 0x1d6   :  { %v619_v48 = vpack.c.bf16 %v598_v47, %v597_v10  ;;  %2366 = vmatprep.subr.bf16.mxu0 %v2626_v2 }
 0x1d7   :  { %v521_v50 = vpop.f32.mrb[16].mxu1 }
 0x1d8   :  { %v522_v51 = vadd.f32 %v3030_v63, %v521_v50  ;;  %v2198_v52 = vpop.f32.mrb[17].mxu1  ;;  %2261 = vmatmul.mubr.bf16.gmra.mrb[64].mxu0 %v619_v48 }
 0x1d9   :  { %v524_v53 = vpop.f32.mrb[18].mxu1  ;;  %2264 = vmatprep.mubr.msk.bf16.mxu0 %vm2627_vm1, %v2626_v2  ;;  %2367 = vmatpush3.bf16.msra.mxu0 %v2797_v21 }
 0x1da   :  { %v525_v12 = vadd.f32 %v3030_v63, %v524_v53  ;;  %v2199_v54 = vpop.f32.mrb[19].mxu1  ;;  %2368 = vmatprep.subr.bf16.mxu0 %v2626_v2  ;;  %v599_v13 = vmax.f32 %v522_v51, 0.0 }
 0x1dc   :  { %v600_v55 = vmax.f32 %v525_v12, 0.0 }
 0x1dd   :  { %2369 = vmatpush3.bf16.msra.mxu0 %v2807_v23 }
 0x1de   :  { %v620_v56 = vpack.c.bf16 %v600_v55, %v599_v13  ;;  %2422 = vmatprep.subr.bf16.mxu0 %v2626_v2 }
 0x1df   :  { %v529_v57 = vpop.f32.mrb[20].mxu1 }
 0x1e0   :  { %v530_v58 = vadd.f32 %v3030_v63, %v529_v57  ;;  %v2202_v59 = vpop.f32.mrb[21].mxu1  ;;  %2265 = vmatmul.mubr.bf16.gmra.mrb[68].mxu0 %v620_v56 }
 0x1e1   :  { %v532_v60 = vpop.f32.mrb[22].mxu1  ;;  %2268 = vmatprep.mubr.msk.bf16.mxu0 %vm2627_vm1, %v2626_v2 }
 0x1e2   :  { %v533_v21 = vadd.f32 %v3030_v63, %v532_v60  ;;  %v2203_v61 = vpop.f32.mrb[23].mxu1  ;;  %v601_v62 = vmax.f32 %v530_v58, 0.0 }
 0x1e4   :  { %v602_v0 = vmax.f32 %v533_v21, 0.0 }
 0x1e6   :  { %v621_v3 = vpack.c.bf16 %v602_v0, %v601_v62 }
 0x1e7   :  { %v537_v4 = vpop.f32.mrb[24].mxu1 }
 0x1e8   :  { %v538_v23 = vadd.f32 %v3030_v63, %v537_v4  ;;  %v2206_v8 = vpop.f32.mrb[25].mxu1  ;;  %2269 = vmatmul.mubr.bf16.gmra.mrb[72].mxu0 %v621_v3 }
 0x1e9   :  { %v540_v11 = vpop.f32.mrb[26].mxu1  ;;  %2272 = vmatprep.mubr.msk.bf16.mxu0 %vm2627_vm1, %v2626_v2 }
 0x1ea   :  { %v541_v14 = vadd.f32 %v3030_v63, %v540_v11  ;;  %v2207_v15 = vpop.f32.mrb[27].mxu1  ;;  %v603_v16 = vmax.f32 %v538_v23, 0.0 }
 0x1ec   :  { %v604_v17 = vmax.f32 %v541_v14, 0.0 }
 0x1ee   :  { %v622_v18 = vpack.c.bf16 %v604_v17, %v603_v16 }
 0x1ef   :  { %v545_v20 = vpop.f32.mrb[28].mxu1 }
 0x1f0   :  { %v546_v22 = vadd.f32 %v3030_v63, %v545_v20  ;;  %v2210_v27 = vpop.f32.mrb[29].mxu1  ;;  %2273 = vmatmul.mubr.bf16.gmra.mrb[76].mxu0 %v622_v18 }
 0x1f1   :  { %v548_v28 = vpop.f32.mrb[30].mxu1  ;;  %2276 = vmatprep.mubr.msk.bf16.mxu0 %vm2627_vm1, %v2626_v2 }
 0x1f2   :  { %v549_v29 = vadd.f32 %v3030_v63, %v548_v28  ;;  %v2211_v30 = vpop.f32.mrb[31].mxu1  ;;  %v605_v31 = vmax.f32 %v546_v22, 0.0 }
 0x1f4   :  { %v606_v32 = vmax.f32 %v549_v29, 0.0 }
 0x1f6   :  { %v623_v33 = vpack.c.bf16 %v606_v32, %v605_v31 }
 0x1f7   :  { %v553_v34 = vpop.f32.mrb[32].mxu1 }
 0x1f8   :  { %v554_v6 = vadd.f32 %v3030_v63, %v553_v34  ;;  %v2214_v35 = vpop.f32.mrb[33].mxu1  ;;  %2277 = vmatmul.mubr.bf16.gmra.mrb[80].mxu0 %v623_v33 }
 0x1f9   :  { %v556_v36 = vpop.f32.mrb[34].mxu1  ;;  %2280 = vmatprep.mubr.msk.bf16.mxu0 %vm2627_vm1, %v2626_v2 }
 0x1fa   :  { %v557_v37 = vadd.f32 %v3030_v63, %v556_v36  ;;  %v2215_v7 = vpop.f32.mrb[35].mxu1  ;;  %v607_v38 = vmax.f32 %v554_v6, 0.0 }
 0x1fc   :  { %v608_v40 = vmax.f32 %v557_v37, 0.0 }
 0x1fe   :  { %v624_v41 = vpack.c.bf16 %v608_v40, %v607_v38 }
 0x1ff   :  { %v561_v42 = vpop.f32.mrb[36].mxu1 }
 0x200   :  { %v562_v43 = vadd.f32 %v3030_v63, %v561_v42  ;;  %v2218_v44 = vpop.f32.mrb[37].mxu1  ;;  %2281 = vmatmul.mubr.bf16.gmra.mrb[84].mxu0 %v624_v41 }
 0x201   :  { %v564_v9 = vpop.f32.mrb[38].mxu1  ;;  %2284 = vmatprep.mubr.msk.bf16.mxu0 %vm2627_vm1, %v2626_v2 }
 0x202   :  { %v565_v46 = vadd.f32 %v3030_v63, %v564_v9  ;;  %v2219_v10 = vpop.f32.mrb[39].mxu1  ;;  %v609_v47 = vmax.f32 %v562_v43, 0.0 }
 0x204   :  { %v610_v48 = vmax.f32 %v565_v46, 0.0 }
 0x206   :  { %v625_v50 = vpack.c.bf16 %v610_v48, %v609_v47 }
 0x207   :  { %v569_v51 = vpop.f32.mrb[40].mxu1 }
 0x208   :  { %v570_v52 = vadd.f32 %v3030_v63, %v569_v51  ;;  %v2222_v53 = vpop.f32.mrb[41].mxu1  ;;  %2285 = vmatmul.mubr.bf16.gmra.mrb[88].mxu0 %v625_v50 }
 0x209   :  { %v572_v12 = vpop.f32.mrb[42].mxu1  ;;  %2288 = vmatprep.mubr.msk.bf16.mxu0 %vm2627_vm1, %v2626_v2 }
 0x20a   :  { %v573_v54 = vadd.f32 %v3030_v63, %v572_v12  ;;  %v2223_v13 = vpop.f32.mrb[43].mxu1  ;;  %v611_v55 = vmax.f32 %v570_v52, 0.0 }
 0x20c   :  { %v612_v56 = vmax.f32 %v573_v54, 0.0 }
 0x20e   :  { %v626_v57 = vpack.c.bf16 %v612_v56, %v611_v55 }
 0x20f   :  { %v577_v58 = vpop.f32.mrb[44].mxu1 }
 0x210   :  { %v578_v59 = vadd.f32 %v3030_v63, %v577_v58  ;;  %v2226_v60 = vpop.f32.mrb[45].mxu1  ;;  %2289 = vmatmul.mubr.bf16.gmra.mrb[92].mxu0 %v626_v57 }
 0x211   :  { %v580_v21 = vpop.f32.mrb[46].mxu1  ;;  %2292 = vmatprep.mubr.msk.bf16.mxu0 %vm2627_vm1, %v2626_v2 }
 0x212   :  { %v581_v61 = vadd.f32 %v3030_v63, %v580_v21  ;;  %v2227_v62 = vpop.f32.mrb[47].mxu1  ;;  %v613_v0 = vmax.f32 %v578_v59, 0.0 }
 0x214   :  { %v614_v3 = vmax.f32 %v581_v61, 0.0 }
 0x216   :  { %v627_v4 = vpack.c.bf16 %v614_v3, %v613_v0 }
 0x217   :  { %v585_v23 = vpop.f32.mrb[48].mxu1 }
 0x218   :  { %v586_v8 = vadd.f32 %v3030_v63, %v585_v23  ;;  %v2230_v11 = vpop.f32.mrb[49].mxu1  ;;  %2293 = vmatmul.mubr.bf16.gmra.mrb[96].mxu0 %v627_v4 }
 0x219   :  { %v588_v14 = vpop.f32.mrb[50].mxu1  ;;  %2296 = vmatprep.mubr.msk.bf16.mxu0 %vm2627_vm1, %v2626_v2 }
 0x21a   :  { %v615_v15 = vmax.f32 %v586_v8, 0.0  ;;  %v2231_v16 = vpop.f32.mrb[51].mxu1 }
 0x21c   :  { %v628_v17 = vpack.c.bf16 %v615_v15, %v615_v15 }
 0x21f   :  { %v998_v18 = vpop.f32.mrb[52].mxu1 }
 0x220   :  { %v999_v20 = vadd.f32 %v2830_v26, %v998_v18  ;;  %2297 = vmatmul.mubr.bf16.gmra.mrb[100].mxu0 %v628_v17  ;;  %v2304_v22 = vpop.f32.mrb[53].mxu1 }
 0x221   :  { %v1001_v27 = vpop.f32.mrb[54].mxu1  ;;  %2370 = vmatprep.mubr.msk.bf16.mxu0 %vm2627_vm1, %v2626_v2 }
 0x222   :  { %v1002_v28 = vadd.f32 %v2830_v26, %v1001_v27  ;;  %v2305_v29 = vpop.f32.mrb[55].mxu1  ;;  %v1100_v30 = vmax.f32 %v999_v20, 0.0 }
 0x224   :  { %v1101_v31 = vmax.f32 %v1002_v28, 0.0 }
 0x226   :  { %v1125_v32 = vpack.c.bf16 %v1101_v31, %v1100_v30 }
 0x227   :  { %v1006_v33 = vpop.f32.mrb[56].mxu1 }
 0x228   :  { %v1007_v34 = vadd.f32 %v2830_v26, %v1006_v33  ;;  %v2308_v6 = vpop.f32.mrb[57].mxu1  ;;  %2371 = vmatmul.mubr.bf16.vlgmr.msra.gmra.mrb[104].mxu0 %v1125_v32 }
 0x229   :  { %v1009_v35 = vpop.f32.mrb[58].mxu1  ;;  %2374 = vmatprep.mubr.msk.bf16.mxu0 %vm2627_vm1, %v2626_v2  ;;  %2423 = vmatpush3.bf16.msra.mxu0 %v2823_v25 }
 0x22a   :  { %v1010_v36 = vadd.f32 %v2830_v26, %v1009_v35  ;;  %v2309_v37 = vpop.f32.mrb[59].mxu1  ;;  %2424 = vmatprep.subr.bf16.mxu0 %v2626_v2  ;;  %v1102_v7 = vmax.f32 %v1007_v34, 0.0 }
 0x22c   :  { %v1103_v38 = vmax.f32 %v1010_v36, 0.0 }
 0x22d   :  { %2425 = vmatpush3.bf16.msra.mxu0 %v2838_v39 }
 0x22e   :  { %v1126_v40 = vpack.c.bf16 %v1103_v38, %v1102_v7  ;;  %2426 = vmatprep.subr.bf16.mxu0 %v2626_v2 }
 0x22f   :  { %v1014_v41 = vpop.f32.mrb[60].mxu1 }
 0x230   :  { %v1015_v42 = vadd.f32 %v2830_v26, %v1014_v41  ;;  %v2312_v43 = vpop.f32.mrb[61].mxu1  ;;  %2375 = vmatmul.mubr.bf16.gmra.mrb[108].mxu0 %v1126_v40 }
 0x231   :  { %v1017_v44 = vpop.f32.mrb[62].mxu1  ;;  %2378 = vmatprep.mubr.msk.bf16.mxu0 %vm2627_vm1, %v2626_v2  ;;  %2427 = vmatpush3.bf16.msra.mxu0 %v2851_v49 }
 0x232   :  { %v1018_v25 = vadd.f32 %v2830_v26, %v1017_v44  ;;  %v2313_v9 = vpop.f32.mrb[63].mxu1  ;;  %2428 = vmatprep.subr.bf16.mxu0 %v2626_v2  ;;  %v1104_v39 = vmax.f32 %v1015_v42, 0.0 }
 0x234   :  { %v1105_v46 = vmax.f32 %v1018_v25, 0.0 }
 0x235   :  { %2429 = vmatpush3.bf16.msra.mxu0 %v2866_v5 }
 0x236   :  { %v1127_v10 = vpack.c.bf16 %v1105_v46, %v1104_v39  ;;  %2430 = vmatprep.subr.bf16.mxu0 %v2626_v2 }
 0x237   :  { %v1022_v47 = vpop.f32.mrb[64].mxu1 }
 0x238   :  { %v1023_v48 = vadd.f32 %v2830_v26, %v1022_v47  ;;  %v2316_v50 = vpop.f32.mrb[65].mxu1  ;;  %2379 = vmatmul.mubr.bf16.gmra.mrb[112].mxu0 %v1127_v10 }
 0x239   :  { %v1025_v51 = vpop.f32.mrb[66].mxu1  ;;  %2382 = vmatprep.mubr.msk.bf16.mxu0 %vm2627_vm1, %v2626_v2  ;;  %2431 = vmatpush3.bf16.msra.mxu0 %v2879_v24 }
 0x23a   :  { %v1026_v49 = vadd.f32 %v2830_v26, %v1025_v51  ;;  %v2317_v52 = vpop.f32.mrb[67].mxu1  ;;  %2432 = vmatprep.subr.bf16.mxu0 %v2626_v2  ;;  %v1106_v5 = vmax.f32 %v1023_v48, 0.0 }
 0x23c   :  { %v1107_v53 = vmax.f32 %v1026_v49, 0.0 }
 0x23d   :  { %2433 = vmatpush3.bf16.msra.mxu0 %v2892_v45 }
 0x23e   :  { %v1128_v12 = vpack.c.bf16 %v1107_v53, %v1106_v5  ;;  %2434 = vmatprep.subr.bf16.mxu0 %v2626_v2 }
 0x23f   :  { %v1030_v54 = vpop.f32.mrb[68].mxu1 }
 0x240   :  { %v1031_v13 = vadd.f32 %v2830_v26, %v1030_v54  ;;  %v2320_v55 = vpop.f32.mrb[69].mxu1  ;;  %2383 = vmatmul.mubr.bf16.gmra.mrb[116].mxu0 %v1128_v12 }
 0x241   :  { %v1033_v56 = vpop.f32.mrb[70].mxu1  ;;  %2386 = vmatprep.mubr.msk.bf16.mxu0 %vm2627_vm1, %v2626_v2  ;;  %2435 = vmatpush3.bf16.msra.mxu0 %v2907_v1 }
 0x242   :  { %v1034_v24 = vadd.f32 %v2830_v26, %v1033_v56  ;;  %v2321_v57 = vpop.f32.mrb[71].mxu1  ;;  %2436 = vmatprep.subr.bf16.mxu0 %v2626_v2  ;;  %v1108_v45 = vmax.f32 %v1031_v13, 0.0  ;;  %v2610_v56 = vld [vmem:[%s3523_s2] ss:$0 sm:$0xff] }
 0x244   :  { %v1109_v58 = vmax.f32 %v1034_v24, 0.0 }
 0x245   :  { %2437 = vmatpush3.bf16.msra.mxu0 %v2918_v19 }
 0x246   :  { %v1129_v59 = vpack.c.bf16 %v1109_v58, %v1108_v45 }
 0x247   :  { %v1038_v60 = vpop.f32.mrb[72].mxu1 }
 0x248   :  { %v1039_v21 = vadd.f32 %v2830_v26, %v1038_v60  ;;  %v2324_v61 = vpop.f32.mrb[73].mxu1  ;;  %2387 = vmatmul.mubr.bf16.gmra.mrb[120].mxu0 %v1129_v59 }
 0x249   :  { %v1041_v62 = vpop.f32.mrb[74].mxu1  ;;  %2390 = vmatprep.mubr.msk.bf16.mxu0 %vm2627_vm1, %v2626_v2 }
 0x24a   :  { %v1042_v1 = vadd.f32 %v2830_v26, %v1041_v62  ;;  %v2325_v0 = vpop.f32.mrb[75].mxu1  ;;  %v1110_v3 = vmax.f32 %v1039_v21, 0.0 }
 0x24c   :  { %v1111_v4 = vmax.f32 %v1042_v1, 0.0 }
 0x24e   :  { %v1130_v23 = vpack.c.bf16 %v1111_v4, %v1110_v3 }
 0x24f   :  { %v1046_v8 = vpop.f32.mrb[76].mxu1 }
 0x250   :  { %v1047_v11 = vadd.f32 %v2830_v26, %v1046_v8  ;;  %v2328_v19 = vpop.f32.mrb[77].mxu1  ;;  %2391 = vmatmul.mubr.bf16.gmra.mrb[124].mxu0 %v1130_v23  ;;  %v3169_v8 = vld [vmem:[#allocation5] ss:$0 sm:$0xff] }
 0x251   :  { %v1049_v14 = vpop.f32.mrb[78].mxu1  ;;  %2394 = vmatprep.mubr.msk.bf16.mxu0 %vm2627_vm1, %v2626_v2 }
 0x252   :  { %v1050_v15 = vadd.f32 %v2830_v26, %v1049_v14  ;;  %v2329_v16 = vpop.f32.mrb[79].mxu1  ;;  %v1112_v17 = vmax.f32 %v1047_v11, 0.0 }
 0x254   :  { %v1113_v18 = vmax.f32 %v1050_v15, 0.0 }
 0x256   :  { %v1131_v20 = vpack.c.bf16 %v1113_v18, %v1112_v17 }
 0x257   :  { %v1054_v22 = vpop.f32.mrb[80].mxu1 }
 0x258   :  { %v1055_v27 = vadd.f32 %v2830_v26, %v1054_v22  ;;  %v2332_v28 = vpop.f32.mrb[81].mxu1  ;;  %2395 = vmatmul.mubr.bf16.gmra.mrb[128].mxu0 %v1131_v20 }
 0x259   :  { %v1057_v29 = vpop.f32.mrb[82].mxu1  ;;  %2398 = vmatprep.mubr.msk.bf16.mxu0 %vm2627_vm1, %v2626_v2 }
 0x25a   :  { %v1058_v30 = vadd.f32 %v2830_v26, %v1057_v29  ;;  %v2333_v31 = vpop.f32.mrb[83].mxu1  ;;  %v1114_v32 = vmax.f32 %v1055_v27, 0.0 }
 0x25c   :  { %v1115_v33 = vmax.f32 %v1058_v30, 0.0 }
 0x25e   :  { %v1132_v34 = vpack.c.bf16 %v1115_v33, %v1114_v32 }
 0x25f   :  { %v1062_v6 = vpop.f32.mrb[84].mxu1 }
 0x260   :  { %v1063_v35 = vadd.f32 %v2830_v26, %v1062_v6  ;;  %v2336_v36 = vpop.f32.mrb[85].mxu1  ;;  %2399 = vmatmul.mubr.bf16.gmra.mrb[132].mxu0 %v1132_v34 }
 0x261   :  { %v1065_v37 = vpop.f32.mrb[86].mxu1  ;;  %2402 = vmatprep.mubr.msk.bf16.mxu0 %vm2627_vm1, %v2626_v2 }
 0x262   :  { %v1066_v7 = vadd.f32 %v2830_v26, %v1065_v37  ;;  %v2337_v38 = vpop.f32.mrb[87].mxu1  ;;  %v1116_v40 = vmax.f32 %v1063_v35, 0.0 }
 0x264   :  { %v1117_v41 = vmax.f32 %v1066_v7, 0.0 }
 0x266   :  { %v1133_v42 = vpack.c.bf16 %v1117_v41, %v1116_v40 }
 0x267   :  { %v1070_v43 = vpop.f32.mrb[88].mxu1 }
 0x268   :  { %v1071_v44 = vadd.f32 %v2830_v26, %v1070_v43  ;;  %v2340_v25 = vpop.f32.mrb[89].mxu1  ;;  %2403 = vmatmul.mubr.bf16.gmra.mrb[136].mxu0 %v1133_v42 }
 0x269   :  { %v1073_v9 = vpop.f32.mrb[90].mxu1  ;;  %2406 = vmatprep.mubr.msk.bf16.mxu0 %vm2627_vm1, %v2626_v2 }
 0x26a   :  { %v1074_v39 = vadd.f32 %v2830_v26, %v1073_v9  ;;  %v2341_v46 = vpop.f32.mrb[91].mxu1  ;;  %v1118_v10 = vmax.f32 %v1071_v44, 0.0 }
 0x26c   :  { %v1119_v47 = vmax.f32 %v1074_v39, 0.0 }
 0x26e   :  { %v1134_v48 = vpack.c.bf16 %v1119_v47, %v1118_v10 }
 0x26f   :  { %v1078_v50 = vpop.f32.mrb[92].mxu1 }
 0x270   :  { %v1079_v51 = vadd.f32 %v2830_v26, %v1078_v50  ;;  %v2344_v49 = vpop.f32.mrb[93].mxu1  ;;  %2407 = vmatmul.mubr.bf16.gmra.mrb[140].mxu0 %v1134_v48 }
 0x271   :  { %v1081_v52 = vpop.f32.mrb[94].mxu1  ;;  %2410 = vmatprep.mubr.msk.bf16.mxu0 %vm2627_vm1, %v2626_v2 }
 0x272   :  { %v1082_v5 = vadd.f32 %v2830_v26, %v1081_v52  ;;  %v2345_v53 = vpop.f32.mrb[95].mxu1  ;;  %v1120_v12 = vmax.f32 %v1079_v51, 0.0 }
 0x274   :  { %v1121_v54 = vmax.f32 %v1082_v5, 0.0 }
 0x276   :  { %v1135_v13 = vpack.c.bf16 %v1121_v54, %v1120_v12 }
 0x277   :  { %v1086_v55 = vpop.f32.mrb[96].mxu1 }
 0x278   :  { %v1087_v24 = vadd.f32 %v2610_v56, %v1086_v55  ;;  %v2348_v57 = vpop.f32.mrb[97].mxu1  ;;  %2411 = vmatmul.mubr.bf16.gmra.mrb[144].mxu0 %v1135_v13 }
 0x279   :  { %v1089_v45 = vpop.f32.mrb[98].mxu1  ;;  %2414 = vmatprep.mubr.msk.bf16.mxu0 %vm2627_vm1, %v2626_v2 }
 0x27a   :  { %v1090_v26 = vadd.f32 %v2610_v56, %v1089_v45  ;;  %v2349_v58 = vpop.f32.mrb[99].mxu1  ;;  %v1122_v59 = vmax.f32 %v1087_v24, 0.0 }
 0x27c   :  { %v1123_v60 = vmax.f32 %v1090_v26, 0.0 }
 0x27e   :  { %v1136_v21 = vpack.c.bf16 %v1123_v60, %v1122_v59 }
 0x27f   :  { %v1094_v61 = vpop.f32.mrb[100].mxu1 }
 0x280   :  { %v1095_v62 = vadd.f32 %v2610_v56, %v1094_v61  ;;  %2415 = vmatmul.mubr.bf16.gmra.mrb[148].mxu0 %v1136_v21  ;;  %v2352_v1 = vpop.f32.mrb[101].mxu1 }
 0x281   :  { %v1097_v0 = vpop.f32.mrb[102].mxu1  ;;  %2418 = vmatprep.mubr.msk.bf16.mxu0 %vm2627_vm1, %v2626_v2 }
 0x282   :  { %v1124_v3 = vmax.f32 %v1095_v62, 0.0  ;;  %v2353_v4 = vpop.f32.mrb[103].mxu1 }
 0x284   :  { %v1137_v23 = vpack.c.bf16 %v1124_v3, %v1124_v3 }
 0x288   :  { %2419 = vmatmul.mubr.bf16.gmra.mrb[152].mxu0 %v1137_v23 }
 0x289   :  { %2438 = vmatprep.mubr.msk.bf16.mxu0 %vm2627_vm1, %v2626_v2 }
 0x293   :  { %v734_v11 = vpop.f32.mrb[52].mxu0 }
 0x294   :  { %v735_v19 = vadd.f32 %v3169_v8, %v734_v11  ;;  %v2250_v14 = vpop.f32.mrb[53].mxu0 }
 0x295   :  { %v737_v15 = vpop.f32.mrb[54].mxu0 }
 0x296   :  { %v738_v16 = vadd.f32 %v3169_v8, %v737_v15  ;;  %v2251_v17 = vpop.f32.mrb[55].mxu0  ;;  %v1806_v18 = vsel %vm1553_vm4, %v735_v19, 0.0 }
 0x298   :  { %v1807_v20 = vsel %vm1553_vm4, %v738_v16, 0.0 }
 0x299   :  { %v1808_v22 = vadd.f32 %v1807_v20, %v1806_v18 }
 0x29b   :  { %v742_v27 = vpop.f32.mrb[56].mxu0 }
 0x29c   :  { %v743_v28 = vadd.f32 %v3169_v8, %v742_v27  ;;  %v2254_v29 = vpop.f32.mrb[57].mxu0 }
 0x29d   :  { %v745_v30 = vpop.f32.mrb[58].mxu0 }
 0x29e   :  { %v1809_v31 = vsel %vm1553_vm4, %v743_v28, 0.0  ;;  %v746_v32 = vadd.f32 %v3169_v8, %v745_v30  ;;  %v2255_v33 = vpop.f32.mrb[59].mxu0 }
 0x29f   :  { %v1810_v34 = vadd.f32 %v1809_v31, %v1808_v22 }
 0x2a0   :  { %v1811_v6 = vsel %vm1553_vm4, %v746_v32, 0.0 }
 0x2a1   :  { %v1812_v35 = vadd.f32 %v1811_v6, %v1810_v34 }
 0x2a3   :  { %v750_v36 = vpop.f32.mrb[60].mxu0 }
 0x2a4   :  { %v751_v37 = vadd.f32 %v3169_v8, %v750_v36  ;;  %v2258_v7 = vpop.f32.mrb[61].mxu0 }
 0x2a5   :  { %v753_v38 = vpop.f32.mrb[62].mxu0 }
 0x2a6   :  { %v1813_v40 = vsel %vm1553_vm4, %v751_v37, 0.0  ;;  %v754_v41 = vadd.f32 %v3169_v8, %v753_v38  ;;  %v2259_v42 = vpop.f32.mrb[63].mxu0 }
 0x2a7   :  { %v1814_v43 = vadd.f32 %v1813_v40, %v1812_v35 }
 0x2a8   :  { %v1815_v44 = vsel %vm1553_vm4, %v754_v41, 0.0 }
 0x2a9   :  { %v1816_v25 = vadd.f32 %v1815_v44, %v1814_v43 }
 0x2ab   :  { %v758_v9 = vpop.f32.mrb[64].mxu0 }
 0x2ac   :  { %v759_v39 = vadd.f32 %v3169_v8, %v758_v9  ;;  %v2262_v46 = vpop.f32.mrb[65].mxu0 }
 0x2ad   :  { %v761_v10 = vpop.f32.mrb[66].mxu0 }
 0x2ae   :  { %v1817_v47 = vsel %vm1553_vm4, %v759_v39, 0.0  ;;  %v762_v48 = vadd.f32 %v3169_v8, %v761_v10  ;;  %v2263_v50 = vpop.f32.mrb[67].mxu0 }
 0x2af   :  { %v1818_v51 = vadd.f32 %v1817_v47, %v1816_v25 }
 0x2b0   :  { %v1819_v49 = vsel %vm1553_vm4, %v762_v48, 0.0 }
 0x2b1   :  { %v1820_v52 = vadd.f32 %v1819_v49, %v1818_v51 }
 0x2b3   :  { %v766_v5 = vpop.f32.mrb[68].mxu0 }
 0x2b4   :  { %v767_v53 = vadd.f32 %v3169_v8, %v766_v5  ;;  %v2266_v12 = vpop.f32.mrb[69].mxu0 }
 0x2b5   :  { %v769_v54 = vpop.f32.mrb[70].mxu0 }
 0x2b6   :  { %v1821_v13 = vsel %vm1553_vm4, %v767_v53, 0.0  ;;  %v770_v55 = vadd.f32 %v3169_v8, %v769_v54  ;;  %v2267_v56 = vpop.f32.mrb[71].mxu0 }
 0x2b7   :  { %v1822_v24 = vadd.f32 %v1821_v13, %v1820_v52 }
 0x2b8   :  { %v1823_v57 = vsel %vm1553_vm4, %v770_v55, 0.0 }
 0x2b9   :  { %v1824_v45 = vadd.f32 %v1823_v57, %v1822_v24 }
 0x2bb   :  { %v774_v26 = vpop.f32.mrb[72].mxu0 }
 0x2bc   :  { %v775_v58 = vadd.f32 %v3169_v8, %v774_v26  ;;  %v2270_v59 = vpop.f32.mrb[73].mxu0 }
 0x2bd   :  { %v777_v60 = vpop.f32.mrb[74].mxu0 }
 0x2be   :  { %v1825_v21 = vsel %vm1553_vm4, %v775_v58, 0.0  ;;  %v778_v61 = vadd.f32 %v3169_v8, %v777_v60  ;;  %v2271_v62 = vpop.f32.mrb[75].mxu0 }
 0x2bf   :  { %v1826_v1 = vadd.f32 %v1825_v21, %v1824_v45 }
 0x2c0   :  { %v1827_v0 = vsel %vm1553_vm4, %v778_v61, 0.0 }
 0x2c1   :  { %v1828_v3 = vadd.f32 %v1827_v0, %v1826_v1 }
 0x2c3   :  { %v782_v4 = vpop.f32.mrb[76].mxu0 }
 0x2c4   :  { %v783_v23 = vadd.f32 %v3169_v8, %v782_v4  ;;  %v2274_v11 = vpop.f32.mrb[77].mxu0 }
 0x2c5   :  { %v785_v19 = vpop.f32.mrb[78].mxu0 }
 0x2c6   :  { %v1829_v14 = vsel %vm1553_vm4, %v783_v23, 0.0  ;;  %v786_v15 = vadd.f32 %v3169_v8, %v785_v19  ;;  %v2275_v16 = vpop.f32.mrb[79].mxu0 }
 0x2c7   :  { %v1830_v17 = vadd.f32 %v1829_v14, %v1828_v3 }
 0x2c8   :  { %v1831_v18 = vsel %vm1553_vm4, %v786_v15, 0.0 }
 0x2c9   :  { %v1832_v20 = vadd.f32 %v1831_v18, %v1830_v17 }
 0x2cb   :  { %v790_v22 = vpop.f32.mrb[80].mxu0 }
 0x2cc   :  { %v791_v27 = vadd.f32 %v3169_v8, %v790_v22  ;;  %v2278_v28 = vpop.f32.mrb[81].mxu0 }
 0x2cd   :  { %v793_v29 = vpop.f32.mrb[82].mxu0 }
 0x2ce   :  { %v1833_v30 = vsel %vm1553_vm4, %v791_v27, 0.0  ;;  %v794_v31 = vadd.f32 %v3169_v8, %v793_v29  ;;  %v2279_v32 = vpop.f32.mrb[83].mxu0 }
 0x2cf   :  { %v1834_v33 = vadd.f32 %v1833_v30, %v1832_v20 }
 0x2d0   :  { %v1835_v34 = vsel %vm1553_vm4, %v794_v31, 0.0 }
 0x2d1   :  { %v1836_v6 = vadd.f32 %v1835_v34, %v1834_v33 }
 0x2d3   :  { %v798_v35 = vpop.f32.mrb[84].mxu0 }
 0x2d4   :  { %v799_v36 = vadd.f32 %v3169_v8, %v798_v35  ;;  %v2282_v37 = vpop.f32.mrb[85].mxu0 }
 0x2d5   :  { %v801_v7 = vpop.f32.mrb[86].mxu0 }
 0x2d6   :  { %v1837_v38 = vsel %vm1553_vm4, %v799_v36, 0.0  ;;  %v802_v40 = vadd.f32 %v3169_v8, %v801_v7  ;;  %v2283_v41 = vpop.f32.mrb[87].mxu0 }
 0x2d7   :  { %v1838_v42 = vadd.f32 %v1837_v38, %v1836_v6  ;;  %v1780_v6 = vld [vmem:[#allocation2] sm:$0x1] }
 0x2d8   :  { %v1839_v43 = vsel %vm1553_vm4, %v802_v40, 0.0 }
 0x2d9   :  { %v1840_v44 = vadd.f32 %v1839_v43, %v1838_v42 }
 0x2db   :  { %v806_v25 = vpop.f32.mrb[88].mxu0 }
 0x2dc   :  { %v807_v9 = vadd.f32 %v3169_v8, %v806_v25  ;;  %v2286_v39 = vpop.f32.mrb[89].mxu0 }
 0x2dd   :  { %v809_v46 = vpop.f32.mrb[90].mxu0 }
 0x2de   :  { %v1841_v10 = vsel %vm1553_vm4, %v807_v9, 0.0  ;;  %v810_v47 = vadd.f32 %v3169_v8, %v809_v46  ;;  %v2287_v48 = vpop.f32.mrb[91].mxu0 }
 0x2df   :  { %v1842_v50 = vadd.f32 %v1841_v10, %v1840_v44 }
 0x2e0   :  { %v1843_v51 = vsel %vm1553_vm4, %v810_v47, 0.0 }
 0x2e1   :  { %v1844_v49 = vadd.f32 %v1843_v51, %v1842_v50 }
 0x2e3   :  { %v814_v52 = vpop.f32.mrb[92].mxu0 }
 0x2e4   :  { %v815_v5 = vadd.f32 %v3169_v8, %v814_v52  ;;  %v2290_v53 = vpop.f32.mrb[93].mxu0 }
 0x2e5   :  { %v817_v12 = vpop.f32.mrb[94].mxu0 }
 0x2e6   :  { %v1845_v54 = vsel %vm1553_vm4, %v815_v5, 0.0  ;;  %v818_v13 = vadd.f32 %v3169_v8, %v817_v12  ;;  %v2291_v55 = vpop.f32.mrb[95].mxu0 }
 0x2e7   :  { %v1846_v56 = vadd.f32 %v1845_v54, %v1844_v49 }
 0x2e8   :  { %v1847_v24 = vsel %vm1553_vm4, %v818_v13, 0.0 }
 0x2e9   :  { %v1848_v57 = vadd.f32 %v1847_v24, %v1846_v56 }
 0x2eb   :  { %v822_v45 = vpop.f32.mrb[96].mxu0 }
 0x2ec   :  { %v823_v26 = vadd.f32 %v3169_v8, %v822_v45  ;;  %v2294_v58 = vpop.f32.mrb[97].mxu0 }
 0x2ed   :  { %v825_v59 = vpop.f32.mrb[98].mxu0 }
 0x2ee   :  { %v1849_v60 = vsel %vm1553_vm4, %v823_v26, 0.0  ;;  %v826_v21 = vadd.f32 %v3169_v8, %v825_v59  ;;  %v2295_v61 = vpop.f32.mrb[99].mxu0 }
 0x2ef   :  { %v1850_v62 = vadd.f32 %v1849_v60, %v1848_v57 }
 0x2f0   :  { %v1851_v1 = vsel %vm1553_vm4, %v826_v21, 0.0 }
 0x2f1   :  { %v1852_v0 = vadd.f32 %v1851_v1, %v1850_v62 }
 0x2f3   :  { %v830_v3 = vpop.f32.mrb[100].mxu0 }
 0x2f4   :  { %v831_v4 = vadd.f32 %v3169_v8, %v830_v3  ;;  %v2298_v23 = vpop.f32.mrb[101].mxu0 }
 0x2f5   :  { %v833_v11 = vpop.f32.mrb[102].mxu0 }
 0x2f6   :  { %v1853_v19 = vsel %vm1553_vm4, %v831_v4, 0.0  ;;  %v2299_v14 = vpop.f32.mrb[103].mxu0 }
 0x2f7   :  { %v1854_v15 = vadd.f32 %v1853_v19, %v1852_v0  ;;  %v3244_v19 = vld [vmem:[%s3525_s4] ss:$0 sm:$0xff] }
 0x2f9   :  { %v1855_v16 = vrot.slane %v1854_v15, 4 }
 0x2fb   :  { %v1856_v17 = vadd.f32 %v1855_v16, %v1854_v15  ;;  %v1172_v18 = vpop.f32.mrb[104].mxu0 }
 0x2fc   :  { %v1173_v20 = vadd.f32 %v3030_v63, %v1172_v18  ;;  %v2372_v22 = vpop.f32.mrb[105].mxu0 }
 0x2fd   :  { %v1857_v27 = vrot.slane %v1856_v17, 2  ;;  %v1175_v28 = vpop.f32.mrb[106].mxu0 }
 0x2fe   :  { %v1176_v29 = vadd.f32 %v3030_v63, %v1175_v28  ;;  %v2373_v30 = vpop.f32.mrb[107].mxu0  ;;  %v1274_v32 = vmax.f32 %v1173_v20, 0.0 }
 0x2ff   :  { %v1858_v31 = vadd.f32 %v1857_v27, %v1856_v17 }
 0x300   :  { %v1275_v33 = vmax.f32 %v1176_v29, 0.0 }
 0x301   :  { %v1859_v34 = vrot.slane %v1858_v31, 1 }
 0x302   :  { %v1299_v35 = vpack.c.bf16 %v1275_v33, %v1274_v32 }
 0x303   :  { %v1860_v36 = vadd.f32 %v1859_v34, %v1858_v31  ;;  %v1180_v37 = vpop.f32.mrb[108].mxu0 }
 0x304   :  { %v1181_v7 = vadd.f32 %v3030_v63, %v1180_v37  ;;  %v2376_v38 = vpop.f32.mrb[109].mxu0  ;;  %2439 = vmatmul.mubr.bf16.vlgmr.msra.gmra.mrb[156].mxu0 %v1299_v35 }
 0x305   :  { %v1861_v40 = vadd.f32 %v1860_v36, %v1780_v6  ;;  %v1183_v41 = vpop.f32.mrb[110].mxu0 }
 0x306   :  { %v1184_v42 = vadd.f32 %v3030_v63, %v1183_v41  ;;  %v2377_v43 = vpop.f32.mrb[111].mxu0  ;;  %v1276_v44 = vmax.f32 %v1181_v7, 0.0 }
 0x307   :  { %1862 = vst.msk [vmem:[#allocation2] sm:$0x1] %vm66_vm3, %v1861_v40 }
 0x308   :  { %v1277_v25 = vmax.f32 %v1184_v42, 0.0 }
 0x30a   :  { %v1300_v9 = vpack.c.bf16 %v1277_v25, %v1276_v44 }
 0x30b   :  { %v1188_v39 = vpop.f32.mrb[112].mxu0 }
 0x30c   :  { %v1189_v46 = vadd.f32 %v3030_v63, %v1188_v39  ;;  %v2380_v10 = vpop.f32.mrb[113].mxu0  ;;  %2443 = vmatmul.mubr.bf16.vlgmr.msra.gmra.mrb[104].mxu1 %v1300_v9 }
 0x30d   :  { %v1191_v47 = vpop.f32.mrb[114].mxu0  ;;  %2446 = vmatprep.mubr.msk.bf16.mxu1 %vm2627_vm1, %v2626_v2 }
 0x30e   :  { %v1192_v48 = vadd.f32 %v3030_v63, %v1191_v47  ;;  %v2381_v50 = vpop.f32.mrb[115].mxu0  ;;  %v1866_v51 = vld [vmem:[#allocation2] sm:$0x1]  ;;  %v1278_v49 = vmax.f32 %v1189_v46, 0.0 }
 0x30f   :  { %2506 = vpush %v1866_v51 }
 0x310   :  { %v1279_v52 = vmax.f32 %v1192_v48, 0.0 }
 0x312   :  { %v1301_v5 = vpack.c.bf16 %v1279_v52, %v1278_v49 }
 0x313   :  { %v1196_v53 = vpop.f32.mrb[116].mxu0 }
 0x314   :  { %v1197_v12 = vadd.f32 %v3030_v63, %v1196_v53  ;;  %v2384_v54 = vpop.f32.mrb[117].mxu0  ;;  %2447 = vmatmul.mubr.bf16.gmra.mrb[108].mxu1 %v1301_v5 }
 0x315   :  { %v1199_v13 = vpop.f32.mrb[118].mxu0  ;;  %2450 = vmatprep.mubr.msk.bf16.mxu1 %vm2627_vm1, %v2626_v2 }
 0x316   :  { %v1200_v55 = vadd.f32 %v3030_v63, %v1199_v13  ;;  %v2385_v56 = vpop.f32.mrb[119].mxu0  ;;  %v1280_v24 = vmax.f32 %v1197_v12, 0.0 }
 0x318   :  { %v1281_v57 = vmax.f32 %v1200_v55, 0.0 }
 0x31a   :  { %v1302_v45 = vpack.c.bf16 %v1281_v57, %v1280_v24 }
 0x31b   :  { %v1204_v26 = vpop.f32.mrb[120].mxu0 }
 0x31c   :  { %v1205_v58 = vadd.f32 %v3030_v63, %v1204_v26  ;;  %v2388_v59 = vpop.f32.mrb[121].mxu0  ;;  %2451 = vmatmul.mubr.bf16.gmra.mrb[112].mxu1 %v1302_v45 }
 0x31d   :  { %v1207_v60 = vpop.f32.mrb[122].mxu0  ;;  %2454 = vmatprep.mubr.msk.bf16.mxu1 %vm2627_vm1, %v2626_v2 }
 0x31e   :  { %v1208_v21 = vadd.f32 %v3030_v63, %v1207_v60  ;;  %v2389_v61 = vpop.f32.mrb[123].mxu0  ;;  %v1282_v62 = vmax.f32 %v1205_v58, 0.0 }
 0x320   :  { %v1283_v1 = vmax.f32 %v1208_v21, 0.0 }
 0x322   :  { %v1303_v0 = vpack.c.bf16 %v1283_v1, %v1282_v62 }
 0x323   :  { %v1212_v3 = vpop.f32.mrb[124].mxu0 }
 0x324   :  { %v1213_v4 = vadd.f32 %v3030_v63, %v1212_v3  ;;  %v2392_v23 = vpop.f32.mrb[125].mxu0  ;;  %2455 = vmatmul.mubr.bf16.gmra.mrb[116].mxu1 %v1303_v0 }
 0x325   :  { %v1215_v11 = vpop.f32.mrb[126].mxu0  ;;  %2458 = vmatprep.mubr.msk.bf16.mxu1 %vm2627_vm1, %v2626_v2 }
 0x326   :  { %v1216_v14 = vadd.f32 %v3244_v19, %v1215_v11  ;;  %v2393_v15 = vpop.f32.mrb[127].mxu0  ;;  %v1284_v16 = vmax.f32 %v1213_v4, 0.0 }
 0x328   :  { %v1285_v17 = vmax.f32 %v1216_v14, 0.0 }
 0x32a   :  { %v1304_v18 = vpack.c.bf16 %v1285_v17, %v1284_v16 }
 0x32b   :  { %v1220_v20 = vpop.f32.mrb[128].mxu0 }
 0x32c   :  { %v1221_v63 = vadd.f32 %v3244_v19, %v1220_v20  ;;  %v2396_v22 = vpop.f32.mrb[129].mxu0  ;;  %2459 = vmatmul.mubr.bf16.gmra.mrb[120].mxu1 %v1304_v18  ;;  %v2628_v20 = vmov -1e+30  }
 0x32d   :  { %v1223_v27 = vpop.f32.mrb[130].mxu0  ;;  %2462 = vmatprep.mubr.msk.bf16.mxu1 %vm2627_vm1, %v2626_v2  ;;  %68 = vst.msk [vmem:[#allocation3] sm:$0x1] %vm66_vm3, %v2628_v20 }
 0x32e   :  { %v1224_v28 = vadd.f32 %v3244_v19, %v1223_v27  ;;  %v2397_v29 = vpop.f32.mrb[131].mxu0  ;;  %v1286_v30 = vmax.f32 %v1221_v63, 0.0 }
 0x330   :  { %v1287_v31 = vmax.f32 %v1224_v28, 0.0 }
 0x332   :  { %v1305_v32 = vpack.c.bf16 %v1287_v31, %v1286_v30 }
 0x333   :  { %v1228_v33 = vpop.f32.mrb[132].mxu0 }
 0x334   :  { %v1229_v34 = vadd.f32 %v3244_v19, %v1228_v33  ;;  %v2400_v6 = vpop.f32.mrb[133].mxu0  ;;  %2463 = vmatmul.mubr.bf16.gmra.mrb[124].mxu1 %v1305_v32 }
 0x335   :  { %v1231_v35 = vpop.f32.mrb[134].mxu0  ;;  %2466 = vmatprep.mubr.msk.bf16.mxu1 %vm2627_vm1, %v2626_v2 }
 0x336   :  { %v1232_v36 = vadd.f32 %v3244_v19, %v1231_v35  ;;  %v2401_v37 = vpop.f32.mrb[135].mxu0  ;;  %v1288_v7 = vmax.f32 %v1229_v34, 0.0 }
 0x338   :  { %v1289_v38 = vmax.f32 %v1232_v36, 0.0 }
 0x33a   :  { %v1306_v40 = vpack.c.bf16 %v1289_v38, %v1288_v7 }
 0x33b   :  { %v1236_v41 = vpop.f32.mrb[136].mxu0 }
 0x33c   :  { %v1237_v42 = vadd.f32 %v3244_v19, %v1236_v41  ;;  %v2404_v43 = vpop.f32.mrb[137].mxu0  ;;  %2467 = vmatmul.mubr.bf16.gmra.mrb[128].mxu1 %v1306_v40 }
 0x33d   :  { %v1239_v44 = vpop.f32.mrb[138].mxu0  ;;  %2470 = vmatprep.mubr.msk.bf16.mxu1 %vm2627_vm1, %v2626_v2 }
 0x33e   :  { %v1240_v25 = vadd.f32 %v3244_v19, %v1239_v44  ;;  %v2405_v9 = vpop.f32.mrb[139].mxu0  ;;  %v1290_v39 = vmax.f32 %v1237_v42, 0.0 }
 0x340   :  { %v1291_v46 = vmax.f32 %v1240_v25, 0.0  ;;  %s2507_s4 = spop %2506 }
 0x341   :  { %1870 = sst [smem:[#allocation6]] %s2507_s4 }
 0x342   :  { %v1307_v10 = vpack.c.bf16 %v1291_v46, %v1290_v39 }
 0x343   :  { %v1244_v47 = vpop.f32.mrb[140].mxu0 }
 0x344   :  { %v1245_v48 = vadd.f32 %v3244_v19, %v1244_v47  ;;  %v2408_v50 = vpop.f32.mrb[141].mxu0  ;;  %2471 = vmatmul.mubr.bf16.gmra.mrb[132].mxu1 %v1307_v10 }
 0x345   :  { %v1247_v51 = vpop.f32.mrb[142].mxu0  ;;  %2474 = vmatprep.mubr.msk.bf16.mxu1 %vm2627_vm1, %v2626_v2 }
 0x346   :  { %v1248_v49 = vadd.f32 %v3244_v19, %v1247_v51  ;;  %v2409_v52 = vpop.f32.mrb[143].mxu0  ;;  %v1292_v5 = vmax.f32 %v1245_v48, 0.0 }
 0x348   :  { %v1293_v53 = vmax.f32 %v1248_v49, 0.0 }
 0x34a   :  { %v1308_v12 = vpack.c.bf16 %v1293_v53, %v1292_v5 }
 0x34b   :  { %v1252_v54 = vpop.f32.mrb[144].mxu0 }
 0x34c   :  { %v1253_v13 = vadd.f32 %v3244_v19, %v1252_v54  ;;  %v2412_v55 = vpop.f32.mrb[145].mxu0  ;;  %2475 = vmatmul.mubr.bf16.gmra.mrb[136].mxu1 %v1308_v12 }
 0x34d   :  { %v1255_v56 = vpop.f32.mrb[146].mxu0  ;;  %2478 = vmatprep.mubr.msk.bf16.mxu1 %vm2627_vm1, %v2626_v2 }
 0x34e   :  { %v1256_v24 = vadd.f32 %v3244_v19, %v1255_v56  ;;  %v2413_v57 = vpop.f32.mrb[147].mxu0  ;;  %v1294_v45 = vmax.f32 %v1253_v13, 0.0 }
 0x350   :  { %v1295_v26 = vmax.f32 %v1256_v24, 0.0 }
 0x352   :  { %v1309_v58 = vpack.c.bf16 %v1295_v26, %v1294_v45 }
 0x353   :  { %v1260_v59 = vpop.f32.mrb[148].mxu0 }
 0x354   :  { %v1261_v60 = vadd.f32 %v3244_v19, %v1260_v59  ;;  %v2416_v21 = vpop.f32.mrb[149].mxu0  ;;  %2479 = vmatmul.mubr.bf16.gmra.mrb[140].mxu1 %v1309_v58 }
 0x355   :  { %v1263_v61 = vpop.f32.mrb[150].mxu0  ;;  %2482 = vmatprep.mubr.msk.bf16.mxu1 %vm2627_vm1, %v2626_v2 }
 0x356   :  { %v1264_v62 = vadd.f32 %v3244_v19, %v1263_v61  ;;  %v2417_v1 = vpop.f32.mrb[151].mxu0  ;;  %v1296_v0 = vmax.f32 %v1261_v60, 0.0 }
 0x358   :  { %v1297_v3 = vmax.f32 %v1264_v62, 0.0 }
 0x35a   :  { %v1310_v4 = vpack.c.bf16 %v1297_v3, %v1296_v0 }
 0x35b   :  { %v1268_v23 = vpop.f32.mrb[152].mxu0 }
 0x35c   :  { %v1269_v11 = vadd.f32 %v3244_v19, %v1268_v23  ;;  %v2420_v14 = vpop.f32.mrb[153].mxu0  ;;  %2483 = vmatmul.mubr.bf16.gmra.mrb[144].mxu1 %v1310_v4 }
 0x35d   :  { %v1271_v15 = vpop.f32.mrb[154].mxu0  ;;  %2486 = vmatprep.mubr.msk.bf16.mxu1 %vm2627_vm1, %v2626_v2 }
 0x35e   :  { %v1298_v16 = vmax.f32 %v1269_v11, 0.0  ;;  %v2421_v17 = vpop.f32.mrb[155].mxu0 }
 0x360   :  { %v1311_v18 = vpack.c.bf16 %v1298_v16, %v1298_v16 }
 0x364   :  { %2487 = vmatmul.mubr.bf16.gmra.mrb[148].mxu1 %v1311_v18 }
 0x3d7   :  { %v1346_v63 = vpop.f32.mrb[156].mxu0 }
 0x3d8   :  { %v2440_v22 = vpop.f32.mrb[157].mxu0  ;;  %v3276_v32 = vadd.f32 %v3169_v8, %v1346_v63 }
 0x3d9   :  { %v1349_v27 = vpop.f32.mrb[158].mxu0 }
 0x3da   :  { %v2441_v28 = vpop.f32.mrb[159].mxu0  ;;  %v3279_v2 = vadd.f32 %v3169_v8, %v1349_v27  ;;  %v1554_v36 = vsel %vm1553_vm4, %v3276_v32, -inf }
 0x3dc   :  { %v1555_v41 = vsel %vm1553_vm4, %v3279_v2, -inf }
 0x3df   :  { %v1354_v29 = vpop.f32.mrb[104].mxu1 }
 0x3e0   :  { %v2444_v30 = vpop.f32.mrb[105].mxu1  ;;  %v3296_v44 = vadd.f32 %v3169_v8, %v1354_v29 }
 0x3e1   :  { %v1357_v19 = vpop.f32.mrb[106].mxu1 }
 0x3e2   :  { %v2445_v31 = vpop.f32.mrb[107].mxu1  ;;  %v3299_v9 = vadd.f32 %v3169_v8, %v1357_v19  ;;  %v1556_v47 = vsel %vm1553_vm4, %v3296_v44, -inf }
 0x3e4   :  { %v1557_v52 = vsel %vm1553_vm4, %v3299_v9, -inf }
 0x3e7   :  { %v1362_v33 = vpop.f32.mrb[108].mxu1 }
 0x3e8   :  { %v3282_v34 = vadd.f32 %v3169_v8, %v1362_v33  ;;  %v2448_v6 = vpop.f32.mrb[109].mxu1 }
 0x3e9   :  { %v1365_v35 = vpop.f32.mrb[110].mxu1 }
 0x3ea   :  { %v1558_v37 = vsel %vm1553_vm4, %v3282_v34, -inf  ;;  %v3289_v7 = vadd.f32 %v3169_v8, %v1365_v35  ;;  %v2449_v38 = vpop.f32.mrb[111].mxu1 }
 0x3eb   :  { %v1559_v40 = vmax.f32 %v1554_v36, %v1558_v37 }
 0x3ec   :  { %v1560_v42 = vsel %vm1553_vm4, %v3289_v7, -inf }
 0x3ed   :  { %v1561_v43 = vmax.f32 %v1555_v41, %v1560_v42 }
 0x3ef   :  { %v1370_v25 = vpop.f32.mrb[112].mxu1 }
 0x3f0   :  { %v3302_v39 = vadd.f32 %v3169_v8, %v1370_v25  ;;  %v2452_v46 = vpop.f32.mrb[113].mxu1 }
 0x3f1   :  { %v1373_v10 = vpop.f32.mrb[114].mxu1 }
 0x3f2   :  { %v1562_v48 = vsel %vm1553_vm4, %v3302_v39, -inf  ;;  %v3309_v50 = vadd.f32 %v3169_v8, %v1373_v10  ;;  %v2453_v51 = vpop.f32.mrb[115].mxu1 }
 0x3f3   :  { %v1563_v49 = vmax.f32 %v1556_v47, %v1562_v48 }
 0x3f4   :  { %v1564_v5 = vsel %vm1553_vm4, %v3309_v50, -inf }
 0x3f5   :  { %v1565_v53 = vmax.f32 %v1557_v52, %v1564_v5 }
 0x3f7   :  { %v1378_v12 = vpop.f32.mrb[116].mxu1 }
 0x3f8   :  { %v3316_v54 = vadd.f32 %v3169_v8, %v1378_v12  ;;  %v2456_v13 = vpop.f32.mrb[117].mxu1 }
 0x3f9   :  { %v1381_v55 = vpop.f32.mrb[118].mxu1 }
 0x3fa   :  { %v1566_v56 = vsel %vm1553_vm4, %v3316_v54, -inf  ;;  %v3321_v24 = vadd.f32 %v3169_v8, %v1381_v55  ;;  %v2457_v57 = vpop.f32.mrb[119].mxu1 }
 0x3fb   :  { %v1567_v45 = vmax.f32 %v1559_v40, %v1566_v56 }
 0x3fc   :  { %v1568_v26 = vsel %vm1553_vm4, %v3321_v24, -inf }
 0x3fd   :  { %v1569_v58 = vmax.f32 %v1561_v43, %v1568_v26 }
 0x3ff   :  { %v1386_v59 = vpop.f32.mrb[120].mxu1 }
 0x400   :  { %v3326_v60 = vadd.f32 %v3169_v8, %v1386_v59  ;;  %v2460_v21 = vpop.f32.mrb[121].mxu1 }
 0x401   :  { %v1389_v61 = vpop.f32.mrb[122].mxu1 }
 0x402   :  { %v1570_v62 = vsel %vm1553_vm4, %v3326_v60, -inf  ;;  %v3331_v1 = vadd.f32 %v3169_v8, %v1389_v61  ;;  %v2461_v0 = vpop.f32.mrb[123].mxu1 }
 0x403   :  { %v1571_v3 = vmax.f32 %v1563_v49, %v1570_v62 }
 0x404   :  { %v1572_v4 = vsel %vm1553_vm4, %v3331_v1, -inf }
 0x405   :  { %v1573_v23 = vmax.f32 %v1565_v53, %v1572_v4 }
 0x407   :  { %v1394_v11 = vpop.f32.mrb[124].mxu1 }
 0x408   :  { %v3336_v14 = vadd.f32 %v3169_v8, %v1394_v11  ;;  %v2464_v15 = vpop.f32.mrb[125].mxu1 }
 0x409   :  { %v1397_v16 = vpop.f32.mrb[126].mxu1 }
 0x40a   :  { %v1574_v17 = vsel %vm1553_vm4, %v3336_v14, -inf  ;;  %v3341_v18 = vadd.f32 %v3169_v8, %v1397_v16  ;;  %v2465_v20 = vpop.f32.mrb[127].mxu1 }
 0x40b   :  { %v1575_v63 = vmax.f32 %v1567_v45, %v1574_v17 }
 0x40c   :  { %v1576_v22 = vsel %vm1553_vm4, %v3341_v18, -inf }
 0x40d   :  { %v1577_v27 = vmax.f32 %v1569_v58, %v1576_v22 }
 0x40f   :  { %v1402_v28 = vpop.f32.mrb[128].mxu1 }
 0x410   :  { %v3346_v29 = vadd.f32 %v3169_v8, %v1402_v28  ;;  %v2468_v30 = vpop.f32.mrb[129].mxu1 }
 0x411   :  { %v1405_v19 = vpop.f32.mrb[130].mxu1 }
 0x412   :  { %v1578_v31 = vsel %vm1553_vm4, %v3346_v29, -inf  ;;  %v3351_v33 = vadd.f32 %v3169_v8, %v1405_v19  ;;  %v2469_v6 = vpop.f32.mrb[131].mxu1 }
 0x413   :  { %v1579_v35 = vmax.f32 %v1571_v3, %v1578_v31 }
 0x414   :  { %v1580_v36 = vsel %vm1553_vm4, %v3351_v33, -inf }
 0x415   :  { %v1581_v37 = vmax.f32 %v1573_v23, %v1580_v36 }
 0x417   :  { %v1410_v38 = vpop.f32.mrb[132].mxu1 }
 0x418   :  { %v3356_v40 = vadd.f32 %v3169_v8, %v1410_v38  ;;  %v2472_v41 = vpop.f32.mrb[133].mxu1 }
 0x419   :  { %v1413_v42 = vpop.f32.mrb[134].mxu1 }
 0x41a   :  { %v1582_v43 = vsel %vm1553_vm4, %v3356_v40, -inf  ;;  %v3361_v25 = vadd.f32 %v3169_v8, %v1413_v42  ;;  %v2473_v46 = vpop.f32.mrb[135].mxu1 }
 0x41b   :  { %v1583_v10 = vmax.f32 %v1575_v63, %v1582_v43 }
 0x41c   :  { %v1584_v47 = vsel %vm1553_vm4, %v3361_v25, -inf }
 0x41d   :  { %v1585_v48 = vmax.f32 %v1577_v27, %v1584_v47 }
 0x41f   :  { %v1418_v51 = vpop.f32.mrb[136].mxu1 }
 0x420   :  { %v3366_v49 = vadd.f32 %v3169_v8, %v1418_v51  ;;  %v2476_v52 = vpop.f32.mrb[137].mxu1 }
 0x421   :  { %v1421_v5 = vpop.f32.mrb[138].mxu1 }
 0x422   :  { %v1586_v53 = vsel %vm1553_vm4, %v3366_v49, -inf  ;;  %v3371_v12 = vadd.f32 %v3169_v8, %v1421_v5  ;;  %v2477_v13 = vpop.f32.mrb[139].mxu1  ;;  %v3400_v5 = vld [vmem:[#allocation3] sm:$0x1] }
 0x423   :  { %v1587_v55 = vmax.f32 %v1579_v35, %v1586_v53 }
 0x424   :  { %v1588_v56 = vsel %vm1553_vm4, %v3371_v12, -inf }
 0x425   :  { %v1589_v57 = vmax.f32 %v1581_v37, %v1588_v56 }
 0x427   :  { %v1426_v45 = vpop.f32.mrb[140].mxu1 }
 0x428   :  { %v3376_v26 = vadd.f32 %v3169_v8, %v1426_v45  ;;  %v2480_v58 = vpop.f32.mrb[141].mxu1 }
 0x429   :  { %v1429_v59 = vpop.f32.mrb[142].mxu1 }
 0x42a   :  { %v1590_v21 = vsel %vm1553_vm4, %v3376_v26, -inf  ;;  %v3381_v61 = vadd.f32 %v3169_v8, %v1429_v59  ;;  %v2481_v62 = vpop.f32.mrb[143].mxu1 }
 0x42b   :  { %v1591_v0 = vmax.f32 %v1583_v10, %v1590_v21  ;;  %v1611_v10 = vlaneseq }
 0x42c   :  { %v1592_v3 = vsel %vm1553_vm4, %v3381_v61, -inf }
 0x42d   :  { %v1593_v4 = vmax.f32 %v1585_v48, %v1592_v3  ;;  %v1612_v51 = vshrl.u32 %v1611_v10, 7 }
 0x42f   :  { %v1434_v23 = vpop.f32.mrb[144].mxu1  ;;  %v1613_v53 = vsub.s32 0, %v1612_v51 }
 0x430   :  { %v3386_v11 = vadd.f32 %v3169_v8, %v1434_v23  ;;  %v2484_v15 = vpop.f32.mrb[145].mxu1 }
 0x431   :  { %v1437_v16 = vpop.f32.mrb[146].mxu1 }
 0x432   :  { %v1594_v17 = vsel %vm1553_vm4, %v3386_v11, -inf  ;;  %v3391_v20 = vadd.f32 %v3169_v8, %v1437_v16  ;;  %v2485_v63 = vpop.f32.mrb[147].mxu1 }
 0x433   :  { %v1595_v22 = vmax.f32 %v1587_v55, %v1594_v17 }
 0x434   :  { %v1596_v27 = vsel %vm1553_vm4, %v3391_v20, -inf }
 0x435   :  { %v1597_v28 = vmax.f32 %v1589_v57, %v1596_v27 }
 0x437   :  { %v1601_v30 = vmax.f32 %v1595_v22, %v1597_v28  ;;  %v1442_v19 = vpop.f32.mrb[148].mxu1 }
 0x438   :  { %v3396_v31 = vadd.f32 %v3169_v8, %v1442_v19  ;;  %v2488_v6 = vpop.f32.mrb[149].mxu1 }
 0x439   :  { %v1445_v35 = vpop.f32.mrb[150].mxu1 }
 0x43a   :  { %v1598_v36 = vsel %vm1553_vm4, %v3396_v31, -inf  ;;  %v2489_v37 = vpop.f32.mrb[151].mxu1 }
 0x43b   :  { %v1599_v38 = vmax.f32 %v1591_v0, %v1598_v36 }
 0x43d   :  { %v1600_v41 = vmax.f32 %v1599_v38, %v1593_v4 }
 0x43f   :  { %v1602_v42 = vmax.f32 %v1600_v41, %v1601_v30 }
 0x441   :  { %v1603_v43 = vrot.slane %v1602_v42, 4 }
 0x443   :  { %v1604_v46 = vmax.f32 %v1602_v42, %v1603_v43 }
 0x445   :  { %v1605_v47 = vrot.slane %v1604_v46, 2 }
 0x447   :  { %v1606_v48 = vmax.f32 %v1604_v46, %v1605_v47 }
 0x449   :  { %v1607_v52 = vrot.slane %v1606_v48, 1 }
 0x44b   :  { %v1608_v8 = vmax.f32 %v1606_v48, %v1607_v52 }
 0x44d   :  { %v3403_v13 = vmax.f32 %v3400_v5, %v1608_v8 }
 0x44f   :  { %v3406_v55 = vrot.slane %v3403_v13, %v1613_v53  ;;  %v1772_v56 = vsub.f32 %v3400_v5, %v3403_v13  ;;  %1779 = vst.msk [vmem:[#allocation3] sm:$0x1] %vm66_vm3, %v3403_v13 }
 0x451   :  { %v1616_v57 = vsub.f32 %v3276_v32, %v3406_v55  ;;  %v1617_v45 = vsub.f32 %v3279_v2, %v3406_v55  ;;  %v1618_v58 = vsub.f32 %v3296_v44, %v3406_v55  ;;  %v1619_v59 = vsub.f32 %v3299_v9, %v3406_v55 }
 0x452   :  { %v1620_v21 = vsub.f32 %v3282_v34, %v3406_v55  ;;  %v1621_v62 = vsub.f32 %v3289_v7, %v3406_v55  ;;  %v1622_v0 = vsub.f32 %v3302_v39, %v3406_v55  ;;  %v1623_v32 = vsub.f32 %v3309_v50, %v3406_v55 }
 0x453   :  { %v1624_v2 = vsub.f32 %v3316_v54, %v3406_v55  ;;  %v1625_v44 = vsub.f32 %v3321_v24, %v3406_v55  ;;  %v1626_v9 = vsub.f32 %v3326_v60, %v3406_v55  ;;  %v1627_v34 = vsub.f32 %v3331_v1, %v3406_v55 }
 0x454   :  { %v1628_v7 = vsub.f32 %v3336_v14, %v3406_v55  ;;  %v1629_v39 = vsub.f32 %v3341_v18, %v3406_v55  ;;  %v1630_v50 = vsub.f32 %v3346_v29, %v3406_v55  ;;  %v1631_v54 = vsub.f32 %v3351_v33, %v3406_v55 }
 0x455   :  { %v1632_v24 = vsub.f32 %v3356_v40, %v3406_v55  ;;  %v1633_v60 = vsub.f32 %v3361_v25, %v3406_v55  ;;  %v1634_v1 = vsub.f32 %v3366_v49, %v3406_v55  ;;  %v1635_v14 = vsub.f32 %v3371_v12, %v3406_v55 }
 0x456   :  { %v1636_v18 = vsub.f32 %v3376_v26, %v3406_v55  ;;  %v1637_v29 = vsub.f32 %v3381_v61, %v3406_v55  ;;  %v1638_v33 = vsub.f32 %v3386_v11, %v3406_v55  ;;  %v1639_v3 = vsub.f32 %v3391_v20, %v3406_v55  ;;  %v1871_v4 = vld [vmem:[#allocation3] sm:$0x1] }
 0x457   :  { %v1640_v23 = vsub.f32 %v3396_v31, %v3406_v55  ;;  %v1641_v15 = vmul.f32 1.442695, %v1616_v57  ;;  %v1643_v16 = vmul.f32 1.442695, %v1617_v45  ;;  %v1645_v17 = vmul.f32 1.442695, %v1618_v58  ;;  %2508 = vpush %v1871_v4 }
 0x458   :  { %v1647_v63 = vmul.f32 1.442695, %v1619_v59  ;;  %v1649_v22 = vmul.f32 1.442695, %v1620_v21  ;;  %v1651_v27 = vmul.f32 1.442695, %v1621_v62 }
 0x459   :  { %2558 = vpow2.f32 %v1641_v15  ;;  %v1653_v28 = vmul.f32 1.442695, %v1622_v0  ;;  %v1655_v30 = vmul.f32 1.442695, %v1623_v32  ;;  %v1657_v19 = vmul.f32 1.442695, %v1624_v2 }
 0x45a   :  { %2560 = vpow2.f32 %v1643_v16  ;;  %v1659_v36 = vmul.f32 1.442695, %v1625_v44  ;;  %v1661_v43 = vmul.f32 1.442695, %v1626_v9  ;;  %v1663_v48 = vmul.f32 1.442695, %v1627_v34 }
 0x45b   :  { %2562 = vpow2.f32 %v1645_v17  ;;  %v1665_v53 = vmul.f32 1.442695, %v1628_v7  ;;  %v1667_v59 = vmul.f32 1.442695, %v1629_v39  ;;  %v1669_v32 = vmul.f32 1.442695, %v1630_v50 }
 0x45c   :  { %2564 = vpow2.f32 %v1647_v63  ;;  %v1671_v34 = vmul.f32 1.442695, %v1631_v54  ;;  %v1673_v39 = vmul.f32 1.442695, %v1632_v24  ;;  %v1675_v50 = vmul.f32 1.442695, %v1633_v60 }
 0x45d   :  { %2566 = vpow2.f32 %v1649_v22 }
 0x45e   :  { %2568 = vpow2.f32 %v1651_v27 }
 0x45f   :  { %2570 = vpow2.f32 %v1653_v28  ;;  %v1677_v28 = vmul.f32 1.442695, %v1634_v1 }
 0x460   :  { %2572 = vpow2.f32 %v1655_v30 }
 0x461   :  { %2574 = vpow2.f32 %v1657_v19  ;;  %v1679_v19 = vmul.f32 1.442695, %v1635_v14 }
 0x462   :  { %2576 = vpow2.f32 %v1659_v36 }
 0x463   :  { %v2559_v6 = vpop.eup %2558  ;;  %2578 = vpow2.f32 %v1661_v43  ;;  %v1687_v43 = vmul.f32 1.442695, %v1639_v3 }
 0x464   :  { %v2561_v35 = vpop.eup %2560  ;;  %v1716_v37 = vsel %vm1553_vm4, %v2559_v6, 0.0  ;;  %2580 = vpow2.f32 %v1663_v48 }
 0x465   :  { %v2563_v38 = vpop.eup %2562  ;;  %v1717_v41 = vsel %vm1553_vm4, %v2561_v35, 0.0  ;;  %2582 = vpow2.f32 %v1665_v53  ;;  %v1681_v35 = vmul.f32 1.442695, %v1636_v18 }
 0x466   :  { %v2565_v42 = vpop.eup %2564  ;;  %v1718_v46 = vadd.f32 %v1717_v41, %v1716_v37  ;;  %v1719_v10 = vsel %vm1553_vm4, %v2563_v38, 0.0  ;;  %2584 = vpow2.f32 %v1667_v59  ;;  %v1683_v37 = vmul.f32 1.442695, %v1637_v29 }
 0x467   :  { %v2567_v47 = vpop.eup %2566  ;;  %v1721_v52 = vsel %vm1553_vm4, %v2565_v42, 0.0  ;;  %2586 = vpow2.f32 %v1669_v32  ;;  %v1685_v41 = vmul.f32 1.442695, %v1638_v33  ;;  %v1773_v32 = vmul.f32 1.442695, %v1772_v56 }
 0x468   :  { %v1720_v51 = vadd.f32 %v1719_v10, %v1718_v46  ;;  %v2569_v8 = vpop.eup %2568  ;;  %v1723_v45 = vsel %vm1553_vm4, %v2567_v47, 0.0  ;;  %2588 = vpow2.f32 %v1671_v34  ;;  %v1689_v10 = vmul.f32 1.442695, %v1640_v23 }
 0x469   :  { %v2571_v58 = vpop.eup %2570  ;;  %v1725_v62 = vsel %vm1553_vm4, %v2569_v8, 0.0  ;;  %2590 = vpow2.f32 %v1673_v39 }
 0x46a   :  { %v1722_v57 = vadd.f32 %v1721_v52, %v1720_v51  ;;  %v2573_v0 = vpop.eup %2572  ;;  %v1727_v44 = vsel %vm1553_vm4, %v2571_v58, 0.0  ;;  %2592 = vpow2.f32 %v1675_v50  ;;  %v1771_v50 = vld [vmem:[#allocation4] sm:$0x1] }
 0x46b   :  { %v2575_v9 = vpop.eup %2574  ;;  %v1729_v7 = vsel %vm1553_vm4, %v2573_v0, 0.0  ;;  %2594 = vpow2.f32 %v1677_v28 }
 0x46c   :  { %v1724_v21 = vadd.f32 %v1723_v45, %v1722_v57  ;;  %v2577_v15 = vpop.eup %2576  ;;  %v1731_v17 = vsel %vm1553_vm4, %v2575_v9, 0.0  ;;  %2596 = vpow2.f32 %v1679_v19 }
 0x46d   :  { %v2579_v63 = vpop.eup %2578  ;;  %v1733_v54 = vsel %vm1553_vm4, %v2577_v15, 0.0  ;;  %2598 = vpow2.f32 %v1681_v35 }
 0x46e   :  { %v1726_v2 = vadd.f32 %v1725_v62, %v1724_v21  ;;  %v2581_v27 = vpop.eup %2580  ;;  %v1735_v24 = vsel %vm1553_vm4, %v2579_v63, 0.0  ;;  %2600 = vpow2.f32 %v1683_v37 }
 0x46f   :  { %v2583_v30 = vpop.eup %2582  ;;  %v1737_v60 = vsel %vm1553_vm4, %v2581_v27, 0.0  ;;  %2602 = vpow2.f32 %v1685_v41 }
 0x470   :  { %v1728_v4 = vadd.f32 %v1727_v44, %v1726_v2  ;;  %v2585_v6 = vpop.eup %2584  ;;  %v1739_v1 = vsel %vm1553_vm4, %v2583_v30, 0.0  ;;  %2604 = vpow2.f32 %v1687_v43 }
 0x471   :  { %v2587_v36 = vpop.eup %2586  ;;  %v1741_v14 = vsel %vm1553_vm4, %v2585_v6, 0.0  ;;  %2606 = vpow2.f32 %v1689_v10 }
 0x472   :  { %v1730_v16 = vadd.f32 %v1729_v7, %v1728_v4  ;;  %v2589_v38 = vpop.eup %2588  ;;  %v1743_v18 = vsel %vm1553_vm4, %v2587_v36, 0.0  ;;  %2608 = vpow2.f32 %v1773_v32 }
 0x473   :  { %v2591_v42 = vpop.eup %2590  ;;  %v1745_v29 = vsel %vm1553_vm4, %v2589_v38, 0.0 }
 0x474   :  { %v1732_v22 = vadd.f32 %v1731_v17, %v1730_v16  ;;  %v2593_v46 = vpop.eup %2592  ;;  %v1747_v33 = vsel %vm1553_vm4, %v2591_v42, 0.0 }
 0x475   :  { %v2595_v47 = vpop.eup %2594  ;;  %v1749_v51 = vsel %vm1553_vm4, %v2593_v46, 0.0 }
 0x476   :  { %v1734_v40 = vadd.f32 %v1733_v54, %v1732_v22  ;;  %v2597_v52 = vpop.eup %2596  ;;  %v1751_v3 = vsel %vm1553_vm4, %v2595_v47, 0.0 }
 0x477   :  { %v2599_v8 = vpop.eup %2598  ;;  %v1753_v57 = vsel %vm1553_vm4, %v2597_v52, 0.0 }
 0x478   :  { %v1736_v25 = vadd.f32 %v1735_v24, %v1734_v40  ;;  %v2601_v31 = vpop.eup %2600  ;;  %v1755_v23 = vsel %vm1553_vm4, %v2599_v8, 0.0 }
 0x479   :  { %v2603_v45 = vpop.eup %2602  ;;  %v1757_v59 = vsel %vm1553_vm4, %v2601_v31, 0.0 }
 0x47a   :  { %v1738_v49 = vadd.f32 %v1737_v60, %v1736_v25  ;;  %v2605_v21 = vpop.eup %2604  ;;  %v1759_v0 = vsel %vm1553_vm4, %v2603_v45, 0.0 }
 0x47b   :  { %v2607_v2 = vpop.eup %2606  ;;  %v1761_v9 = vsel %vm1553_vm4, %v2605_v21, 0.0 }
 0x47c   :  { %v1740_v12 = vadd.f32 %v1739_v1, %v1738_v49  ;;  %v1763_v4 = vsel %vm1553_vm4, %v2607_v2, 0.0  ;;  %v2609_v63 = vpop.eup %2608 }
 0x47d   :  { %v1775_v27 = vmul.f32 %v2609_v63, %v1771_v50 }
 0x47e   :  { %v1742_v26 = vadd.f32 %v1741_v14, %v1740_v12 }
 0x480   :  { %v1744_v61 = vadd.f32 %v1743_v18, %v1742_v26 }
 0x482   :  { %v1746_v11 = vadd.f32 %v1745_v29, %v1744_v61 }
 0x484   :  { %v1748_v48 = vadd.f32 %v1747_v33, %v1746_v11 }
 0x486   :  { %v1750_v20 = vadd.f32 %v1749_v51, %v1748_v48 }
 0x488   :  { %v1752_v53 = vadd.f32 %v1751_v3, %v1750_v20  ;;  %s2509_s14 = spop %2508 }
 0x489   :  { %1875 = sst [smem:[#allocation6 + $0x1]] %s2509_s14 }
 0x48a   :  { %v1754_v55 = vadd.f32 %v1753_v57, %v1752_v53 }
 0x48c   :  { %v1756_v58 = vadd.f32 %v1755_v23, %v1754_v55 }
 0x48e   :  { %v1758_v62 = vadd.f32 %v1757_v59, %v1756_v58 }
 0x490   :  { %v1760_v44 = vadd.f32 %v1759_v0, %v1758_v62 }
 0x492   :  { %v1762_v34 = vadd.f32 %v1761_v9, %v1760_v44 }
 0x494   :  { %v1764_v7 = vadd.f32 %v1763_v4, %v1762_v34 }
 0x496   :  { %v1765_v15 = vrot.slane %v1764_v7, 4 }
 0x498   :  { %v1766_v39 = vadd.f32 %v1765_v15, %v1764_v7 }
 0x49a   :  { %v1767_v16 = vrot.slane %v1766_v39, 2 }
 0x49c   :  { %v1768_v17 = vadd.f32 %v1767_v16, %v1766_v39 }
 0x49e   :  { %v1769_v22 = vrot.slane %v1768_v17, 1 }
 0x4a0   :  { %v1770_v54 = vadd.f32 %v1769_v22, %v1768_v17 }
 0x4a2   :  { %v1776_v5 = vadd.f32 %v1775_v27, %v1770_v54 }
 0x4a4   :  { %1778 = vst.msk [vmem:[#allocation4] sm:$0x1] %vm66_vm3, %v1776_v5 }
 0x4ab   :  { %v1876_v13 = vld [vmem:[#allocation4] sm:$0x1] }
 0x4ac   :  { %2510 = vpush %v1876_v13 }
 0x4dd   :  { %s2511_s18 = spop %2510 }
 0x4de   :  { %1880 = sst [smem:[#allocation6 + $0x2]] %s2511_s18 }
 0x4df   :  { %2623 = shalt.err (!%p2620_p4)
}
 0x4e0   :  { %s2629_s3 = smov [#allocation6]  }
 0x4e1   :  { %1890 = dma.smem_to_vmem %s2629_s3, 16, %s1888_s17, [#allocation7]  }
 0x4e2   :  { %2624 = dma.done.wait [#allocation7], 16  }
 0x4e3   :  { %2625 = vsyncadd [#allocation7], 4294967280 }
 0x4e4   :  { %1894 = sfence }
 0x4e5   :  { %1895 = vsyncpa [#allocation7], 1 }

</bundles_post_ra>
